<compile_context>
chip_gen: v6e
topology: v6e:2x2x1
jax: 0.10.0
libtpu: 0.0.40
codegen_flags: <defaults>
</compile_context>

<pallas_src>
import math
import functools

import jax
import jax.numpy as jnp
from jax.experimental import pallas as pl
from jax.experimental.pallas import tpu as pltpu


def _pick_vmem_limit():
    # v5e/v6e: 128 MiB physical -> 96 MiB scoped (room for two full per-block
    # weight sets of the depth-prefetch pipeline + resident tokens).
    # v7x: 64 MiB physical -> ~51 MiB scoped.
    try:
        phys = int(pltpu.get_tpu_info().vmem_capacity_bytes)
    except Exception:
        phys = 128 * 1024 * 1024
    return min(96 * 1024 * 1024, (phys * 4) // 5)


_VMEM_LIMIT = _pick_vmem_limit()


def _round_up(v, m):
    return ((v + m - 1) // m) * m


# ----------------------------------------------------------------------------
# In-kernel helpers
# ----------------------------------------------------------------------------
def _layernorm(x, g, b, eps=1e-5):
    mu = jnp.mean(x, axis=-1, keepdims=True)
    var = jnp.mean(jnp.square(x - mu), axis=-1, keepdims=True)
    return (x - mu) * jax.lax.rsqrt(var + eps) * g + b


def _gelu_exact(x):
    # Matches torch.nn.GELU() default (erf-based, not tanh approximation).
    return 0.5 * x * (1.0 + jax.lax.erf(x * (1.0 / math.sqrt(2.0))))


# ----------------------------------------------------------------------------
# Kernels
# ----------------------------------------------------------------------------
def _patch_embed_kernel(patch_ref, w_ref, b_ref, pos_ref, cls_ref, out_ref,
                        *, n_patches):
    # patch_ref: (1, P, K) bf16   w_ref: (K, E) bf16
    # b_ref: (1, E) f32   pos_ref: (P, E) f32   cls_ref: (1, E) f32
    # out_ref: (1, Npad, E) f32 -- rows [0,P) = patches (sublane-aligned store
    # at row 0), row P = class token (LAST valid row), rows (P, Npad) = zeros.
    proj = jnp.dot(patch_ref[0], w_ref[...], preferred_element_type=jnp.float32)
    proj = proj + b_ref[...] + pos_ref[...]
    P = n_patches
    npad = out_ref.shape[1]
    E = out_ref.shape[2]
    out_ref[0, 0:P, :] = proj
    out_ref[0, P:P + 1, :] = cls_ref[...]
    if P + 1 < npad:
        out_ref[0, P + 1:, :] = jnp.zeros((npad - P - 1, E), jnp.float32)


def _encoder_stack_kernel(tok_ref, ln1_g_ref, ln1_b_ref, wqkv_ref, bqkv_ref,
                          wproj_ref, bproj_ref, ln2_g_ref, ln2_b_ref,
                          wfc1_ref, bfc1_ref, wfc2_ref, bfc2_ref, out_ref,
                          *, head_count, valid_tokens):
    d = pl.program_id(1)

    # First depth step of this batch item: bring the tokens into the resident
    # output block; they then stay in VMEM for the whole encoder stack.
    @pl.when(d == 0)
    def _():
        out_ref[...] = tok_ref[...]

    x = out_ref[0]                                     # (Npad, C) f32, resident
    npad, C = x.shape
    H = head_count
    hd = C // H

    # --- self attention on attention-norm(x) ---
    h = _layernorm(x, ln1_g_ref[0], ln1_b_ref[0]).astype(jnp.bfloat16)
    # Single full-width QKV matmul (attention scale pre-folded into q cols).
    qkv = jnp.dot(h, wqkv_ref[0],
                  preferred_element_type=jnp.float32) + bqkv_ref[0]   # (Npad, 3C)

    if valid_tokens < npad:
        col = jax.lax.broadcasted_iota(jnp.int32, (1, npad), 1)
        key_bias = jnp.where(col < valid_tokens, 0.0, -1e30).astype(jnp.float32)
    else:
        key_bias = None

    # Per-head attention with an accumulating output projection:
    #   attn = sum_h softmax(q_h k_h^T) v_h @ Wproj_h   (== concat(heads)@Wproj)
    attn = jnp.zeros((npad, C), jnp.float32)
    for hi in range(H):
        q_h = qkv[:, hi * hd:(hi + 1) * hd].astype(jnp.bfloat16)
        k_h = qkv[:, C + hi * hd:C + (hi + 1) * hd].astype(jnp.bfloat16)
        v_h = qkv[:, 2 * C + hi * hd:2 * C + (hi + 1) * hd].astype(jnp.bfloat16)
        s = jnp.einsum('qd,kd->qk', q_h, k_h,
                       preferred_element_type=jnp.float32)           # (Npad, Npad)
        if key_bias is not None:
            s = s + key_bias                                          # mask pad keys
        s = s - jnp.max(s, axis=-1, keepdims=True)
        e = jnp.exp(s)
        p = e * pl.reciprocal(jnp.sum(e, axis=-1, keepdims=True), approx=True)
        y_h = jnp.dot(p.astype(jnp.bfloat16), v_h,
                      preferred_element_type=jnp.float32)             # (Npad, hd)
        attn = attn + jnp.dot(y_h.astype(jnp.bfloat16), wproj_ref[0, hi],
                              preferred_element_type=jnp.float32)     # (Npad, C)
    y0 = x + attn + bproj_ref[0]

    # --- MLP on mlp-norm(y0) ---
    h2 = _layernorm(y0, ln2_g_ref[0], ln2_b_ref[0]).astype(jnp.bfloat16)
    m = jnp.dot(h2, wfc1_ref[0], preferred_element_type=jnp.float32) + bfc1_ref[0]
    m = _gelu_exact(m).astype(jnp.bfloat16)
    m = jnp.dot(m, wfc2_ref[0], preferred_element_type=jnp.float32) + bfc2_ref[0]
    out_ref[0] = y0 + m


def _head_kernel(cls_ref, lnf_g_ref, lnf_b_ref, whead_ref, out_ref):
    # Only the class token feeds the head; the final LayerNorm is per-token so
    # applying it to the class-token row only is identical to the reference.
    cls = _layernorm(cls_ref[...], lnf_g_ref[...], lnf_b_ref[...])
    sq = jnp.sum(cls * cls, axis=-1, keepdims=True)
    cls = cls * jax.lax.rsqrt(jnp.maximum(sq, 1e-24))   # F.normalize(p=2, eps=1e-12)
    out_ref[...] = jnp.dot(cls.astype(jnp.bfloat16), whead_ref[...],
                           preferred_element_type=jnp.float32)


# ----------------------------------------------------------------------------
# pallas_call wrappers
# ----------------------------------------------------------------------------
def _full_spec(a):
    nd = a.ndim
    return pl.BlockSpec(a.shape, lambda i, _nd=nd: (0,) * _nd)


def _depth_spec(a):
    rest = a.shape[1:]
    n = len(rest)
    return pl.BlockSpec((1,) + rest, lambda b, d, _n=n: (d,) + (0,) * _n)


def patch_embed(patches, w, b, pos, cls):
    B, P, K = patches.shape
    E = w.shape[1]
    npad = _round_up(P + 1, 8)
    kernel = functools.partial(_patch_embed_kernel, n_patches=P)
    return pl.pallas_call(
        kernel,
        out_shape=jax.ShapeDtypeStruct((B, npad, E), jnp.float32),
        grid=(B,),
        in_specs=[pl.BlockSpec((1, P, K), lambda i: (i, 0, 0)),
                  _full_spec(w), _full_spec(b), _full_spec(pos), _full_spec(cls)],
        out_specs=pl.BlockSpec((1, npad, E), lambda i: (i, 0, 0)),
        compiler_params=pltpu.CompilerParams(
            dimension_semantics=("parallel",),
            vmem_limit_bytes=_VMEM_LIMIT),
    )(patches, w, b, pos, cls)


def encoder_stack(tokens, stack, head_count, valid_tokens):
    # One pallas_call for the whole encoder stack: grid=(B, depth).  The token
    # block is resident across the depth axis; stacked weights are indexed by
    # the depth grid index and prefetched under compute.
    B, npad, C = tokens.shape
    names = ['ln1_g', 'ln1_b', 'wqkv', 'bqkv', 'wproj_h', 'bproj',
             'ln2_g', 'ln2_b', 'wfc1', 'bfc1', 'wfc2', 'bfc2']
    args = [stack[n] for n in names]
    depth = stack['wqkv'].shape[0]
    kernel = functools.partial(_encoder_stack_kernel, head_count=head_count,
                               valid_tokens=valid_tokens)
    tok_in_spec = pl.BlockSpec((1, npad, C), lambda b, d: (b, 0, 0))
    tok_out_spec = pl.BlockSpec((1, npad, C), lambda b, d: (b, 0, 0))
    # TODO(synk): for B==1 on v7x, add a parallel query-split grid axis so the
    # second TensorCore is not idle.
    return pl.pallas_call(
        kernel,
        out_shape=jax.ShapeDtypeStruct((B, npad, C), jnp.float32),
        grid=(B, depth),
        in_specs=[tok_in_spec] + [_depth_spec(a) for a in args],
        out_specs=tok_out_spec,
        input_output_aliases={0: 0},       # token buffer updated in place
        compiler_params=pltpu.CompilerParams(
            dimension_semantics=("parallel", "arbitrary"),
            vmem_limit_bytes=_VMEM_LIMIT),
    )(tokens, *args)


def head_call(cls_feat, lnf_g, lnf_b, whead):
    B, C = cls_feat.shape
    ccp = whead.shape[1]
    return pl.pallas_call(
        _head_kernel,
        out_shape=jax.ShapeDtypeStruct((B, ccp), jnp.float32),
        grid=(1,),
        in_specs=[_full_spec(cls_feat), _full_spec(lnf_g),
                  _full_spec(lnf_b), _full_spec(whead)],
        out_specs=pl.BlockSpec((B, ccp), lambda i: (0, 0)),
        compiler_params=pltpu.CompilerParams(vmem_limit_bytes=_VMEM_LIMIT),
    )(cls_feat, lnf_g, lnf_b, whead)


# ----------------------------------------------------------------------------
# Vit forward (eval mode, distilled=False, output_embeddings=False)
# ----------------------------------------------------------------------------
@functools.partial(jax.jit,
                   static_argnames=("patch_size", "stride", "head_count",
                                    "class_count"))
def vit_forward(x, params, *, patch_size, stride, head_count, class_count):
    # TODO(synk): only stride == patch_size (non-overlapping patches) supported,
    # which is the module's default configuration.
    assert stride == patch_size
    B, C_in, Himg, Wimg = x.shape
    ph = pw = patch_size
    gh, gw = Himg // stride, Wimg // stride
    P = gh * gw

    # Conv2d(kernel=stride=patch) rewritten as patch extraction + matmul.
    patches = (x.reshape(B, C_in, gh, ph, gw, pw)
                .transpose(0, 2, 4, 1, 3, 5)
                .reshape(B, P, C_in * ph * pw)).astype(jnp.bfloat16)

    # Patch projection + positional embedding + class-token append (fused).
    tokens = patch_embed(patches, params['patch_w'], params['patch_b'],
                         params['pos'], params['cls'])        # (B, Npad, E) f32

    # TODO(synk): training-mode patchout (torch.randperm row/column dropping)
    # and dropout layers are no-ops in eval mode and are not implemented here.
    tokens = encoder_stack(tokens, params['stack'], head_count,
                           valid_tokens=P + 1)

    cls_feat = tokens[:, P, :]                 # class token lives in row P
    logits = head_call(cls_feat, params['lnf_g'], params['lnf_b'],
                       params['head_w'])       # (B, padded)
    return logits[:, :class_count]


# ----------------------------------------------------------------------------
# Parameters: deterministic raw init (shapes follow the module's __init__)
# and a one-time "prepare" pass (bf16 cast, depth-stacked weights, scale
# folding, per-head projection layout, lane-dense head padding).
# ----------------------------------------------------------------------------
def init_params(key, *, in_channels, patch_size, grid_size, embedding_size,
                head_count, depth, class_count):
    E = embedding_size
    ks = jax.random.split(key, 8 + depth)

    def tn(k, shape, std=0.02):
        return (std * jax.random.truncated_normal(k, -2.0, 2.0, shape)).astype(jnp.float32)

    params = {
        'conv_w': tn(ks[0], (E, in_channels, patch_size, patch_size)),
        'conv_b': jnp.zeros((E,), jnp.float32),
        'class_token': tn(ks[1], (1, 1, E)),
        'class_pos': tn(ks[2], (1, 1, E)),
        'freq_pos': tn(ks[3], (1, E, grid_size[0], 1)),
        'time_pos': tn(ks[4], (1, E, 1, grid_size[1])),
        'lnf_g': jnp.ones((1, E), jnp.float32),
        'lnf_b': jnp.zeros((1, E), jnp.float32),
        # NOTE: module inits the head to zeros; random kept so output is non-trivial.
        'head_w': tn(ks[5], (E, class_count)),
    }
    blocks = []
    for d in range(depth):
        bk = jax.random.split(ks[8 + d], 4)
        blocks.append({
            'ln1_g': jnp.ones((1, E), jnp.float32), 'ln1_b': jnp.zeros((1, E), jnp.float32),
            'wqkv': tn(bk[0], (E, 3 * E)), 'bqkv': jnp.zeros((1, 3 * E), jnp.float32),
            'wproj': tn(bk[1], (E, E)), 'bproj': jnp.zeros((1, E), jnp.float32),
            'ln2_g': jnp.ones((1, E), jnp.float32), 'ln2_b': jnp.zeros((1, E), jnp.float32),
            'wfc1': tn(bk[2], (E, 4 * E)), 'bfc1': jnp.zeros((1, 4 * E), jnp.float32),
            'wfc2': tn(bk[3], (4 * E, E)), 'bfc2': jnp.zeros((1, E), jnp.float32),
        })
    params['blocks'] = blocks
    return params


def prepare_params(raw, *, head_count, grid_size):
    E = raw['conv_w'].shape[0]
    H = head_count
    hd = E // H
    gh, gw = grid_size
    scale = 1.0 / math.sqrt(hd)

    p = {
        'patch_w': raw['conv_w'].reshape(E, -1).T.astype(jnp.bfloat16),
        'patch_b': raw['conv_b'].reshape(1, E).astype(jnp.float32),
        'cls': (raw['class_token'] + raw['class_pos']).reshape(1, E).astype(jnp.float32),
        'lnf_g': raw['lnf_g'].astype(jnp.float32),
        'lnf_b': raw['lnf_b'].astype(jnp.float32),
    }
    # positional embedding = time_pos (broadcast over freq) + freq_pos
    # (broadcast over time), flattened in the same (gh, gw) order as
    # embedding.flatten(2).transpose(1, 2).
    pos = raw['time_pos'][0] + raw['freq_pos'][0]               # (E, gh, gw)
    p['pos'] = pos.transpose(1, 2, 0).reshape(gh * gw, E).astype(jnp.float32)

    cc = raw['head_w'].shape[1]
    ccpad = _round_up(cc, 128)                                  # lane-dense logits
    p['head_w'] = jnp.pad(raw['head_w'], ((0, 0), (0, ccpad - cc))).astype(jnp.bfloat16)

    # --- depth-stacked encoder weights ---
    def prep_block(b):
        # Fold the 1/sqrt(head_dim) attention scale into the q columns of the
        # QKV weight / bias (torch column order of qkv is (part, head, hd),
        # so q occupies columns [0, E)).
        wqkv = b['wqkv'].at[:, :E].multiply(scale)
        bqkv = b['bqkv'].at[:, :E].multiply(scale)
        # Projection weight (C, C): rows grouped per head -> (H, hd, C) so the
        # kernel can accumulate y_h @ Wproj_h per head.
        wproj_h = b['wproj'].reshape(H, hd, E)
        return {
            'ln1_g': b['ln1_g'].astype(jnp.float32),
            'ln1_b': b['ln1_b'].astype(jnp.float32),
            'wqkv': wqkv.astype(jnp.bfloat16),
            'bqkv': bqkv.astype(jnp.float32),
            'wproj_h': wproj_h.astype(jnp.bfloat16),
            'bproj': b['bproj'].astype(jnp.float32),
            'ln2_g': b['ln2_g'].astype(jnp.float32),
            'ln2_b': b['ln2_b'].astype(jnp.float32),
            'wfc1': b['wfc1'].astype(jnp.bfloat16),
            'bfc1': b['bfc1'].astype(jnp.float32),
            'wfc2': b['wfc2'].astype(jnp.bfloat16),
            'bfc2': b['bfc2'].astype(jnp.float32),
        }

    prepped = [prep_block(b) for b in raw['blocks']]
    p['stack'] = {k: jnp.stack([blk[k] for blk in prepped], axis=0)
                  for k in prepped[0]}
    return p


if __name__ == "__main__":
    B, C_in, HW = 2, 4, 16
    patch_size = stride = 8
    E, heads, depth, classes = 32, 4, 2, 16
    gh, gw = HW // stride, HW // stride

    key = jax.random.PRNGKey(0)
    kx, kp = jax.random.split(key)
    x = jax.random.normal(kx, (B, C_in, HW, HW), jnp.float32)
    raw = init_params(kp, in_channels=C_in, patch_size=patch_size,
                      grid_size=(gh, gw), embedding_size=E,
                      head_count=heads, depth=depth, class_count=classes)
    params = prepare_params(raw, head_count=heads, grid_size=(gh, gw))

    y = vit_forward(x, params, patch_size=patch_size, stride=stride,
                    head_count=heads, class_count=classes)
    y = jax.block_until_ready(y)
    assert y.shape == (B, classes) and y.dtype == jnp.float32
    assert bool(jnp.all(jnp.isfinite(y)))
    print("KERNEL_OK")
</pallas_src>

<mosaic_0001>
module attributes {stable_mosaic.version = 11 : i64} {
  func.func @_patch_embed_kernel(%arg0: i32, %arg1: memref<1x4x256xbf16, #tpu.memory_space<vmem>>, %arg2: memref<256x32xbf16, #tpu.memory_space<vmem>>, %arg3: memref<1x32xf32, #tpu.memory_space<vmem>>, %arg4: memref<4x32xf32, #tpu.memory_space<vmem>>, %arg5: memref<1x32xf32, #tpu.memory_space<vmem>>, %arg6: memref<1x8x32xf32, #tpu.memory_space<vmem>>) attributes {dimension_semantics = [#tpu.dimension_semantics<parallel>], iteration_bounds = array<i64: 2>, scalar_prefetch = 0 : i64, scratch_operands = 0 : i64, tpu.core_type = #tpu.core_type<tc>, window_params = [{transform_indices = @transform_0, window_bounds = array<i64: 1, 4, 256>}, {pipeline_mode = #tpu.pipeline_mode<synchronous>, transform_indices = @transform_1, window_bounds = array<i64: 256, 32>}, {pipeline_mode = #tpu.pipeline_mode<synchronous>, transform_indices = @transform_2, window_bounds = array<i64: 1, 32>}, {pipeline_mode = #tpu.pipeline_mode<synchronous>, transform_indices = @transform_3, window_bounds = array<i64: 4, 32>}, {pipeline_mode = #tpu.pipeline_mode<synchronous>, transform_indices = @transform_4, window_bounds = array<i64: 1, 32>}, {transform_indices = @transform_5, window_bounds = array<i64: 1, 8, 32>}]} {
    %c0 = arith.constant 0 : index
    %c0_0 = arith.constant 0 : index
    %c0_1 = arith.constant 0 : index
    %0 = vector.load %arg1[%c0, %c0_0, %c0_1] : memref<1x4x256xbf16, #tpu.memory_space<vmem>>, vector<1x4x256xbf16>
    %1 = vector.shape_cast %0 : vector<1x4x256xbf16> to vector<4x256xbf16>
    %c0_2 = arith.constant 0 : index
    %c0_3 = arith.constant 0 : index
    %2 = vector.load %arg2[%c0_2, %c0_3] : memref<256x32xbf16, #tpu.memory_space<vmem>>, vector<256x32xbf16>
    %cst = arith.constant dense<0.000000e+00> : vector<4x32xf32>
    %3 = tpu.matmul %1, %2, %cst {dimension_numbers = #tpu.dot_dimension_numbers<[1], [0], [0], [1], [0, 0, 1, 1], [], []>} : vector<4x256xbf16>, vector<256x32xbf16>, vector<4x32xf32> -> vector<4x32xf32>
    %c0_4 = arith.constant 0 : index
    %c0_5 = arith.constant 0 : index
    %4 = vector.load %arg3[%c0_4, %c0_5] : memref<1x32xf32, #tpu.memory_space<vmem>>, vector<1x32xf32>
    %5 = vector.broadcast %4 : vector<1x32xf32> to vector<4x32xf32>
    %6 = arith.addf %3, %5 : vector<4x32xf32>
    %c0_6 = arith.constant 0 : index
    %c0_7 = arith.constant 0 : index
    %7 = vector.load %arg4[%c0_6, %c0_7] : memref<4x32xf32, #tpu.memory_space<vmem>>, vector<4x32xf32>
    %8 = arith.addf %6, %7 : vector<4x32xf32>
    %c0_8 = arith.constant 0 : index
    %c0_9 = arith.constant 0 : index
    %c0_10 = arith.constant 0 : index
    %9 = vector.load %arg6[%c0_8, %c0_9, %c0_10] : memref<1x8x32xf32, #tpu.memory_space<vmem>>, vector<1x4x32xf32>
    %10 = vector.shape_cast %9 : vector<1x4x32xf32> to vector<4x32xf32>
    %11 = vector.shape_cast %8 : vector<4x32xf32> to vector<1x4x32xf32>
    tpu.vector_store %arg6[%c0_8, %c0_9, %c0_10], %11 {strides = array<i32>} : memref<1x8x32xf32, #tpu.memory_space<vmem>>, vector<1x4x32xf32>,
    %c0_11 = arith.constant 0 : index
    %c0_12 = arith.constant 0 : index
    %12 = vector.load %arg5[%c0_11, %c0_12] : memref<1x32xf32, #tpu.memory_space<vmem>>, vector<1x32xf32>
    %c0_13 = arith.constant 0 : index
    %c4 = arith.constant 4 : index
    %c0_14 = arith.constant 0 : index
    %13 = vector.load %arg6[%c0_13, %c4, %c0_14] : memref<1x8x32xf32, #tpu.memory_space<vmem>>, vector<1x1x32xf32>
    %14 = vector.shape_cast %13 : vector<1x1x32xf32> to vector<1x32xf32>
    %15 = vector.shape_cast %12 : vector<1x32xf32> to vector<1x1x32xf32>
    tpu.vector_store %arg6[%c0_13, %c4, %c0_14], %15 {strides = array<i32>} : memref<1x8x32xf32, #tpu.memory_space<vmem>>, vector<1x1x32xf32>,
    %cst_15 = arith.constant 0.000000e+00 : f32
    %16 = vector.broadcast %cst_15 : f32 to vector<3x32xf32>
    %c0_16 = arith.constant 0 : index
    %c5 = arith.constant 5 : index
    %c0_17 = arith.constant 0 : index
    %17 = vector.load %arg6[%c0_16, %c5, %c0_17] : memref<1x8x32xf32, #tpu.memory_space<vmem>>, vector<1x3x32xf32>
    %18 = vector.shape_cast %17 : vector<1x3x32xf32> to vector<3x32xf32>
    %19 = vector.shape_cast %16 : vector<3x32xf32> to vector<1x3x32xf32>
    tpu.vector_store %arg6[%c0_16, %c5, %c0_17], %19 {strides = array<i32>} : memref<1x8x32xf32, #tpu.memory_space<vmem>>, vector<1x3x32xf32>,
    return
  }
  func.func @transform_0(%arg0: i32) -> (i32, i32, i32) {
    %c0_i32 = arith.constant 0 : i32
    %c0_i32_0 = arith.constant 0 : i32
    %c0_i32_1 = arith.constant 0 : i32
    return %arg0, %c0_i32, %c0_i32_0 : i32, i32, i32
  }
  func.func @transform_1(%arg0: i32) -> (i32, i32) {
    %c0_i32 = arith.constant 0 : i32
    %c0_i32_0 = arith.constant 0 : i32
    %c0_i32_1 = arith.constant 0 : i32
    return %c0_i32, %c0_i32_0 : i32, i32
  }
  func.func @transform_2(%arg0: i32) -> (i32, i32) {
    %c0_i32 = arith.constant 0 : i32
    %c0_i32_0 = arith.constant 0 : i32
    %c0_i32_1 = arith.constant 0 : i32
    return %c0_i32, %c0_i32_0 : i32, i32
  }
  func.func @transform_3(%arg0: i32) -> (i32, i32) {
    %c0_i32 = arith.constant 0 : i32
    %c0_i32_0 = arith.constant 0 : i32
    %c0_i32_1 = arith.constant 0 : i32
    return %c0_i32, %c0_i32_0 : i32, i32
  }
  func.func @transform_4(%arg0: i32) -> (i32, i32) {
    %c0_i32 = arith.constant 0 : i32
    %c0_i32_0 = arith.constant 0 : i32
    %c0_i32_1 = arith.constant 0 : i32
    return %c0_i32, %c0_i32_0 : i32, i32
  }
  func.func @transform_5(%arg0: i32) -> (i32, i32, i32) {
    %c0_i32 = arith.constant 0 : i32
    %c0_i32_0 = arith.constant 0 : i32
    %c0_i32_1 = arith.constant 0 : i32
    return %arg0, %c0_i32, %c0_i32_0 : i32, i32, i32
  }
}

module attributes {stable_mosaic.version = 11 : i64} {
  func.func @_encoder_stack_kernel(%arg0: i32, %arg1: i32, %arg2: memref<1x8x32xf32, #tpu.memory_space<vmem>>, %arg3: memref<1x1x32xf32, #tpu.memory_space<vmem>>, %arg4: memref<1x1x32xf32, #tpu.memory_space<vmem>>, %arg5: memref<1x32x96xbf16, #tpu.memory_space<vmem>>, %arg6: memref<1x1x96xf32, #tpu.memory_space<vmem>>, %arg7: memref<1x4x8x32xbf16, #tpu.memory_space<vmem>>, %arg8: memref<1x1x32xf32, #tpu.memory_space<vmem>>, %arg9: memref<1x1x32xf32, #tpu.memory_space<vmem>>, %arg10: memref<1x1x32xf32, #tpu.memory_space<vmem>>, %arg11: memref<1x32x128xbf16, #tpu.memory_space<vmem>>, %arg12: memref<1x1x128xf32, #tpu.memory_space<vmem>>, %arg13: memref<1x128x32xbf16, #tpu.memory_space<vmem>>, %arg14: memref<1x1x32xf32, #tpu.memory_space<vmem>>, %arg15: memref<1x8x32xf32, #tpu.memory_space<vmem>>) attributes {dimension_semantics = [#tpu.dimension_semantics<parallel>, #tpu.dimension_semantics<arbitrary>], iteration_bounds = array<i64: 2, 2>, scalar_prefetch = 0 : i64, scratch_operands = 0 : i64, tpu.core_type = #tpu.core_type<tc>, window_params = [{transform_indices = @transform_0, window_bounds = array<i64: 1, 8, 32>}, {transform_indices = @transform_1, window_bounds = array<i64: 1, 1, 32>}, {transform_indices = @transform_2, window_bounds = array<i64: 1, 1, 32>}, {transform_indices = @transform_3, window_bounds = array<i64: 1, 32, 96>}, {transform_indices = @transform_4, window_bounds = array<i64: 1, 1, 96>}, {transform_indices = @transform_5, window_bounds = array<i64: 1, 4, 8, 32>}, {transform_indices = @transform_6, window_bounds = array<i64: 1, 1, 32>}, {transform_indices = @transform_7, window_bounds = array<i64: 1, 1, 32>}, {transform_indices = @transform_8, window_bounds = array<i64: 1, 1, 32>}, {transform_indices = @transform_9, window_bounds = array<i64: 1, 32, 128>}, {transform_indices = @transform_10, window_bounds = array<i64: 1, 1, 128>}, {transform_indices = @transform_11, window_bounds = array<i64: 1, 128, 32>}, {transform_indices = @transform_12, window_bounds = array<i64: 1, 1, 32>}, {transform_indices = @transform_13, window_bounds = array<i64: 1, 8, 32>}]} {
    %c0_i32 = arith.constant 0 : i32
    %0 = arith.cmpi eq, %arg1, %c0_i32 : i32
    %1 = arith.extui %0 : i1 to i32
    %c0_i32_0 = arith.constant 0 : i32
    %2 = arith.cmpi ne, %1, %c0_i32_0 : i32
    scf.if %2 {
      %c0_90 = arith.constant 0 : index
      %c0_91 = arith.constant 0 : index
      %c0_92 = arith.constant 0 : index
      %209 = vector.load %arg2[%c0_90, %c0_91, %c0_92] : memref<1x8x32xf32, #tpu.memory_space<vmem>>, vector<1x8x32xf32>
      %c0_93 = arith.constant 0 : index
      %c0_94 = arith.constant 0 : index
      %c0_95 = arith.constant 0 : index
      %210 = vector.load %arg15[%c0_93, %c0_94, %c0_95] : memref<1x8x32xf32, #tpu.memory_space<vmem>>, vector<1x8x32xf32>
      tpu.vector_store %arg15[%c0_93, %c0_94, %c0_95], %209 {strides = array<i32>} : memref<1x8x32xf32, #tpu.memory_space<vmem>>, vector<1x8x32xf32>,
    } else {
    }
    %c0 = arith.constant 0 : index
    %c0_1 = arith.constant 0 : index
    %c0_2 = arith.constant 0 : index
    %3 = vector.load %arg15[%c0, %c0_1, %c0_2] : memref<1x8x32xf32, #tpu.memory_space<vmem>>, vector<1x8x32xf32>
    %4 = vector.shape_cast %3 : vector<1x8x32xf32> to vector<8x32xf32>
    %c0_3 = arith.constant 0 : index
    %c0_4 = arith.constant 0 : index
    %c0_5 = arith.constant 0 : index
    %5 = vector.load %arg3[%c0_3, %c0_4, %c0_5] : memref<1x1x32xf32, #tpu.memory_space<vmem>>, vector<1x1x32xf32>
    %6 = vector.shape_cast %5 : vector<1x1x32xf32> to vector<1x32xf32>
    %c0_6 = arith.constant 0 : index
    %c0_7 = arith.constant 0 : index
    %c0_8 = arith.constant 0 : index
    %7 = vector.load %arg4[%c0_6, %c0_7, %c0_8] : memref<1x1x32xf32, #tpu.memory_space<vmem>>, vector<1x1x32xf32>
    %8 = vector.shape_cast %7 : vector<1x1x32xf32> to vector<1x32xf32>
    %cst = arith.constant dense<0.000000e+00> : vector<8xf32>
    %9 = vector.multi_reduction <add>, %4, %cst [1] : vector<8x32xf32> to vector<8xf32>
    %10 = vector.shape_cast %9 : vector<8xf32> to vector<8x1xf32>
    %cst_9 = arith.constant 3.200000e+01 : f32
    %11 = vector.broadcast %cst_9 : f32 to vector<8x1xf32>
    %12 = arith.divf %10, %11 : vector<8x1xf32>
    %13 = vector.broadcast %12 : vector<8x1xf32> to vector<8x32xf32>
    %14 = arith.subf %4, %13 : vector<8x32xf32>
    %15 = arith.mulf %14, %14 : vector<8x32xf32>
    %cst_10 = arith.constant dense<0.000000e+00> : vector<8xf32>
    %16 = vector.multi_reduction <add>, %15, %cst_10 [1] : vector<8x32xf32> to vector<8xf32>
    %17 = vector.shape_cast %16 : vector<8xf32> to vector<8x1xf32>
    %cst_11 = arith.constant 3.200000e+01 : f32
    %18 = vector.broadcast %cst_11 : f32 to vector<8x1xf32>
    %19 = arith.divf %17, %18 : vector<8x1xf32>
    %20 = vector.broadcast %12 : vector<8x1xf32> to vector<8x32xf32>
    %21 = arith.subf %4, %20 : vector<8x32xf32>
    %cst_12 = arith.constant 9.99999974E-6 : f32
    %22 = vector.broadcast %cst_12 : f32 to vector<8x1xf32>
    %23 = arith.addf %19, %22 : vector<8x1xf32>
    %24 = math.rsqrt %23 : vector<8x1xf32>
    %25 = vector.broadcast %24 : vector<8x1xf32> to vector<8x32xf32>
    %26 = arith.mulf %21, %25 : vector<8x32xf32>
    %27 = vector.broadcast %6 : vector<1x32xf32> to vector<8x32xf32>
    %28 = arith.mulf %26, %27 : vector<8x32xf32>
    %29 = vector.broadcast %8 : vector<1x32xf32> to vector<8x32xf32>
    %30 = arith.addf %28, %29 : vector<8x32xf32>
    %31 = arith.truncf %30 : vector<8x32xf32> to vector<8x32xbf16>
    %c0_13 = arith.constant 0 : index
    %c0_14 = arith.constant 0 : index
    %c0_15 = arith.constant 0 : index
    %32 = vector.load %arg5[%c0_13, %c0_14, %c0_15] : memref<1x32x96xbf16, #tpu.memory_space<vmem>>, vector<1x32x96xbf16>
    %33 = vector.shape_cast %32 : vector<1x32x96xbf16> to vector<32x96xbf16>
    %cst_16 = arith.constant dense<0.000000e+00> : vector<8x96xf32>
    %34 = tpu.matmul %31, %33, %cst_16 {dimension_numbers = #tpu.dot_dimension_numbers<[1], [0], [0], [1], [0, 0, 1, 1], [], []>} : vector<8x32xbf16>, vector<32x96xbf16>, vector<8x96xf32> -> vector<8x96xf32>
    %c0_17 = arith.constant 0 : index
    %c0_18 = arith.constant 0 : index
    %c0_19 = arith.constant 0 : index
    %35 = vector.load %arg6[%c0_17, %c0_18, %c0_19] : memref<1x1x96xf32, #tpu.memory_space<vmem>>, vector<1x1x96xf32>
    %36 = vector.shape_cast %35 : vector<1x1x96xf32> to vector<1x96xf32>
    %37 = vector.broadcast %36 : vector<1x96xf32> to vector<8x96xf32>
    %38 = arith.addf %34, %37 : vector<8x96xf32>
    %39 = tpu.iota {dimensions = array<i32: 1>} : vector<1x8xi32>
    %c5_i32 = arith.constant 5 : i32
    %40 = vector.broadcast %c5_i32 : i32 to vector<1x8xi32>
    %41 = arith.cmpi slt, %39, %40 : vector<1x8xi32>
    %cst_20 = arith.constant 0.000000e+00 : f32
    %cst_21 = arith.constant -1.000000e+30 : f32
    %42 = vector.broadcast %cst_20 : f32 to vector<1x8xf32>
    %43 = vector.broadcast %cst_21 : f32 to vector<1x8xf32>
    %44 = arith.select %41, %42, %43 : vector<1x8xi1>, vector<1x8xf32>
    %cst_22 = arith.constant 0.000000e+00 : f32
    %45 = vector.broadcast %cst_22 : f32 to vector<8x32xf32>
    %46 = vector.extract_strided_slice %38 {offsets = [0, 0], sizes = [8, 8], strides = [1, 1]} : vector<8x96xf32> to vector<8x8xf32>
    %47 = arith.truncf %46 : vector<8x8xf32> to vector<8x8xbf16>
    %48 = vector.extract_strided_slice %38 {offsets = [0, 32], sizes = [8, 8], strides = [1, 1]} : vector<8x96xf32> to vector<8x8xf32>
    %49 = arith.truncf %48 : vector<8x8xf32> to vector<8x8xbf16>
    %50 = vector.extract_strided_slice %38 {offsets = [0, 64], sizes = [8, 8], strides = [1, 1]} : vector<8x96xf32> to vector<8x8xf32>
    %51 = arith.truncf %50 : vector<8x8xf32> to vector<8x8xbf16>
    "tpu.trace_start"() <{level = 10 : i32, message = "qd,kd->qk"}> : () -> ()
    %cst_23 = arith.constant dense<0.000000e+00> : vector<8x8xf32>
    %52 = tpu.matmul %47, %49, %cst_23 {dimension_numbers = #tpu.dot_dimension_numbers<[1], [1], [0], [0], [0, 0, 1, 0], [], []>} : vector<8x8xbf16>, vector<8x8xbf16>, vector<8x8xf32> -> vector<8x8xf32>
    "tpu.trace_stop"() : () -> ()
    %53 = vector.broadcast %44 : vector<1x8xf32> to vector<8x8xf32>
    %54 = arith.addf %52, %53 : vector<8x8xf32>
    %cst_24 = arith.constant dense<0xFF800000> : vector<8xf32>
    %55 = vector.multi_reduction <maximumf>, %54, %cst_24 [1] : vector<8x8xf32> to vector<8xf32>
    %56 = vector.shape_cast %55 : vector<8xf32> to vector<8x1xf32>
    %57 = vector.broadcast %56 : vector<8x1xf32> to vector<8x8xf32>
    %58 = arith.subf %54, %57 : vector<8x8xf32>
    %59 = math.exp %58 : vector<8x8xf32>
    %cst_25 = arith.constant dense<0.000000e+00> : vector<8xf32>
    %60 = vector.multi_reduction <add>, %59, %cst_25 [1] : vector<8x8xf32> to vector<8xf32>
    %61 = vector.shape_cast %60 : vector<8xf32> to vector<8x1xf32>
    %62 = tpu.reciprocal %61 {approx = true} : vector<8x1xf32> -> vector<8x1xf32>
    %63 = vector.broadcast %62 : vector<8x1xf32> to vector<8x8xf32>
    %64 = arith.mulf %59, %63 : vector<8x8xf32>
    %65 = arith.truncf %64 : vector<8x8xf32> to vector<8x8xbf16>
    %cst_26 = arith.constant dense<0.000000e+00> : vector<8x8xf32>
    %66 = tpu.matmul %65, %51, %cst_26 {dimension_numbers = #tpu.dot_dimension_numbers<[1], [0], [0], [1], [0, 0, 1, 1], [], []>} : vector<8x8xbf16>, vector<8x8xbf16>, vector<8x8xf32> -> vector<8x8xf32>
    %67 = arith.truncf %66 : vector<8x8xf32> to vector<8x8xbf16>
    %c0_27 = arith.constant 0 : index
    %c0_28 = arith.constant 0 : index
    %c0_29 = arith.constant 0 : index
    %c0_30 = arith.constant 0 : index
    %68 = vector.load %arg7[%c0_27, %c0_28, %c0_29, %c0_30] : memref<1x4x8x32xbf16, #tpu.memory_space<vmem>>, vector<1x1x8x32xbf16>
    %69 = vector.shape_cast %68 : vector<1x1x8x32xbf16> to vector<8x32xbf16>
    %cst_31 = arith.constant dense<0.000000e+00> : vector<8x32xf32>
    %70 = tpu.matmul %67, %69, %cst_31 {dimension_numbers = #tpu.dot_dimension_numbers<[1], [0], [0], [1], [0, 0, 1, 1], [], []>} : vector<8x8xbf16>, vector<8x32xbf16>, vector<8x32xf32> -> vector<8x32xf32>
    %71 = arith.addf %45, %70 : vector<8x32xf32>
    %72 = vector.extract_strided_slice %38 {offsets = [0, 8], sizes = [8, 8], strides = [1, 1]} : vector<8x96xf32> to vector<8x8xf32>
    %73 = arith.truncf %72 : vector<8x8xf32> to vector<8x8xbf16>
    %74 = vector.extract_strided_slice %38 {offsets = [0, 40], sizes = [8, 8], strides = [1, 1]} : vector<8x96xf32> to vector<8x8xf32>
    %75 = arith.truncf %74 : vector<8x8xf32> to vector<8x8xbf16>
    %76 = vector.extract_strided_slice %38 {offsets = [0, 72], sizes = [8, 8], strides = [1, 1]} : vector<8x96xf32> to vector<8x8xf32>
    %77 = arith.truncf %76 : vector<8x8xf32> to vector<8x8xbf16>
    "tpu.trace_start"() <{level = 10 : i32, message = "qd,kd->qk"}> : () -> ()
    %cst_32 = arith.constant dense<0.000000e+00> : vector<8x8xf32>
    %78 = tpu.matmul %73, %75, %cst_32 {dimension_numbers = #tpu.dot_dimension_numbers<[1], [1], [0], [0], [0, 0, 1, 0], [], []>} : vector<8x8xbf16>, vector<8x8xbf16>, vector<8x8xf32> -> vector<8x8xf32>
    "tpu.trace_stop"() : () -> ()
    %79 = vector.broadcast %44 : vector<1x8xf32> to vector<8x8xf32>
    %80 = arith.addf %78, %79 : vector<8x8xf32>
    %cst_33 = arith.constant dense<0xFF800000> : vector<8xf32>
    %81 = vector.multi_reduction <maximumf>, %80, %cst_33 [1] : vector<8x8xf32> to vector<8xf32>
    %82 = vector.shape_cast %81 : vector<8xf32> to vector<8x1xf32>
    %83 = vector.broadcast %82 : vector<8x1xf32> to vector<8x8xf32>
    %84 = arith.subf %80, %83 : vector<8x8xf32>
    %85 = math.exp %84 : vector<8x8xf32>
    %cst_34 = arith.constant dense<0.000000e+00> : vector<8xf32>
    %86 = vector.multi_reduction <add>, %85, %cst_34 [1] : vector<8x8xf32> to vector<8xf32>
    %87 = vector.shape_cast %86 : vector<8xf32> to vector<8x1xf32>
    %88 = tpu.reciprocal %87 {approx = true} : vector<8x1xf32> -> vector<8x1xf32>
    %89 = vector.broadcast %88 : vector<8x1xf32> to vector<8x8xf32>
    %90 = arith.mulf %85, %89 : vector<8x8xf32>
    %91 = arith.truncf %90 : vector<8x8xf32> to vector<8x8xbf16>
    %cst_35 = arith.constant dense<0.000000e+00> : vector<8x8xf32>
    %92 = tpu.matmul %91, %77, %cst_35 {dimension_numbers = #tpu.dot_dimension_numbers<[1], [0], [0], [1], [0, 0, 1, 1], [], []>} : vector<8x8xbf16>, vector<8x8xbf16>, vector<8x8xf32> -> vector<8x8xf32>
    %93 = arith.truncf %92 : vector<8x8xf32> to vector<8x8xbf16>
    %c0_36 = arith.constant 0 : index
    %c1 = arith.constant 1 : index
    %c0_37 = arith.constant 0 : index
    %c0_38 = arith.constant 0 : index
    %94 = vector.load %arg7[%c0_36, %c1, %c0_37, %c0_38] : memref<1x4x8x32xbf16, #tpu.memory_space<vmem>>, vector<1x1x8x32xbf16>
    %95 = vector.shape_cast %94 : vector<1x1x8x32xbf16> to vector<8x32xbf16>
    %cst_39 = arith.constant dense<0.000000e+00> : vector<8x32xf32>
    %96 = tpu.matmul %93, %95, %cst_39 {dimension_numbers = #tpu.dot_dimension_numbers<[1], [0], [0], [1], [0, 0, 1, 1], [], []>} : vector<8x8xbf16>, vector<8x32xbf16>, vector<8x32xf32> -> vector<8x32xf32>
    %97 = arith.addf %71, %96 : vector<8x32xf32>
    %98 = vector.extract_strided_slice %38 {offsets = [0, 16], sizes = [8, 8], strides = [1, 1]} : vector<8x96xf32> to vector<8x8xf32>
    %99 = arith.truncf %98 : vector<8x8xf32> to vector<8x8xbf16>
    %100 = vector.extract_strided_slice %38 {offsets = [0, 48], sizes = [8, 8], strides = [1, 1]} : vector<8x96xf32> to vector<8x8xf32>
    %101 = arith.truncf %100 : vector<8x8xf32> to vector<8x8xbf16>
    %102 = vector.extract_strided_slice %38 {offsets = [0, 80], sizes = [8, 8], strides = [1, 1]} : vector<8x96xf32> to vector<8x8xf32>
    %103 = arith.truncf %102 : vector<8x8xf32> to vector<8x8xbf16>
    "tpu.trace_start"() <{level = 10 : i32, message = "qd,kd->qk"}> : () -> ()
    %cst_40 = arith.constant dense<0.000000e+00> : vector<8x8xf32>
    %104 = tpu.matmul %99, %101, %cst_40 {dimension_numbers = #tpu.dot_dimension_numbers<[1], [1], [0], [0], [0, 0, 1, 0], [], []>} : vector<8x8xbf16>, vector<8x8xbf16>, vector<8x8xf32> -> vector<8x8xf32>
    "tpu.trace_stop"() : () -> ()
    %105 = vector.broadcast %44 : vector<1x8xf32> to vector<8x8xf32>
    %106 = arith.addf %104, %105 : vector<8x8xf32>
    %cst_41 = arith.constant dense<0xFF800000> : vector<8xf32>
    %107 = vector.multi_reduction <maximumf>, %106, %cst_41 [1] : vector<8x8xf32> to vector<8xf32>
    %108 = vector.shape_cast %107 : vector<8xf32> to vector<8x1xf32>
    %109 = vector.broadcast %108 : vector<8x1xf32> to vector<8x8xf32>
    %110 = arith.subf %106, %109 : vector<8x8xf32>
    %111 = math.exp %110 : vector<8x8xf32>
    %cst_42 = arith.constant dense<0.000000e+00> : vector<8xf32>
    %112 = vector.multi_reduction <add>, %111, %cst_42 [1] : vector<8x8xf32> to vector<8xf32>
    %113 = vector.shape_cast %112 : vector<8xf32> to vector<8x1xf32>
    %114 = tpu.reciprocal %113 {approx = true} : vector<8x1xf32> -> vector<8x1xf32>
    %115 = vector.broadcast %114 : vector<8x1xf32> to vector<8x8xf32>
    %116 = arith.mulf %111, %115 : vector<8x8xf32>
    %117 = arith.truncf %116 : vector<8x8xf32> to vector<8x8xbf16>
    %cst_43 = arith.constant dense<0.000000e+00> : vector<8x8xf32>
    %118 = tpu.matmul %117, %103, %cst_43 {dimension_numbers = #tpu.dot_dimension_numbers<[1], [0], [0], [1], [0, 0, 1, 1], [], []>} : vector<8x8xbf16>, vector<8x8xbf16>, vector<8x8xf32> -> vector<8x8xf32>
    %119 = arith.truncf %118 : vector<8x8xf32> to vector<8x8xbf16>
    %c0_44 = arith.constant 0 : index
    %c2 = arith.constant 2 : index
    %c0_45 = arith.constant 0 : index
    %c0_46 = arith.constant 0 : index
    %120 = vector.load %arg7[%c0_44, %c2, %c0_45, %c0_46] : memref<1x4x8x32xbf16, #tpu.memory_space<vmem>>, vector<1x1x8x32xbf16>
    %121 = vector.shape_cast %120 : vector<1x1x8x32xbf16> to vector<8x32xbf16>
    %cst_47 = arith.constant dense<0.000000e+00> : vector<8x32xf32>
    %122 = tpu.matmul %119, %121, %cst_47 {dimension_numbers = #tpu.dot_dimension_numbers<[1], [0], [0], [1], [0, 0, 1, 1], [], []>} : vector<8x8xbf16>, vector<8x32xbf16>, vector<8x32xf32> -> vector<8x32xf32>
    %123 = arith.addf %97, %122 : vector<8x32xf32>
    %124 = vector.extract_strided_slice %38 {offsets = [0, 24], sizes = [8, 8], strides = [1, 1]} : vector<8x96xf32> to vector<8x8xf32>
    %125 = arith.truncf %124 : vector<8x8xf32> to vector<8x8xbf16>
    %126 = vector.extract_strided_slice %38 {offsets = [0, 56], sizes = [8, 8], strides = [1, 1]} : vector<8x96xf32> to vector<8x8xf32>
    %127 = arith.truncf %126 : vector<8x8xf32> to vector<8x8xbf16>
    %128 = vector.extract_strided_slice %38 {offsets = [0, 88], sizes = [8, 8], strides = [1, 1]} : vector<8x96xf32> to vector<8x8xf32>
    %129 = arith.truncf %128 : vector<8x8xf32> to vector<8x8xbf16>
    "tpu.trace_start"() <{level = 10 : i32, message = "qd,kd->qk"}> : () -> ()
    %cst_48 = arith.constant dense<0.000000e+00> : vector<8x8xf32>
    %130 = tpu.matmul %125, %127, %cst_48 {dimension_numbers = #tpu.dot_dimension_numbers<[1], [1], [0], [0], [0, 0, 1, 0], [], []>} : vector<8x8xbf16>, vector<8x8xbf16>, vector<8x8xf32> -> vector<8x8xf32>
    "tpu.trace_stop"() : () -> ()
    %131 = vector.broadcast %44 : vector<1x8xf32> to vector<8x8xf32>
    %132 = arith.addf %130, %131 : vector<8x8xf32>
    %cst_49 = arith.constant dense<0xFF800000> : vector<8xf32>
    %133 = vector.multi_reduction <maximumf>, %132, %cst_49 [1] : vector<8x8xf32> to vector<8xf32>
    %134 = vector.shape_cast %133 : vector<8xf32> to vector<8x1xf32>
    %135 = vector.broadcast %134 : vector<8x1xf32> to vector<8x8xf32>
    %136 = arith.subf %132, %135 : vector<8x8xf32>
    %137 = math.exp %136 : vector<8x8xf32>
    %cst_50 = arith.constant dense<0.000000e+00> : vector<8xf32>
    %138 = vector.multi_reduction <add>, %137, %cst_50 [1] : vector<8x8xf32> to vector<8xf32>
    %139 = vector.shape_cast %138 : vector<8xf32> to vector<8x1xf32>
    %140 = tpu.reciprocal %139 {approx = true} : vector<8x1xf32> -> vector<8x1xf32>
    %141 = vector.broadcast %140 : vector<8x1xf32> to vector<8x8xf32>
    %142 = arith.mulf %137, %141 : vector<8x8xf32>
    %143 = arith.truncf %142 : vector<8x8xf32> to vector<8x8xbf16>
    %cst_51 = arith.constant dense<0.000000e+00> : vector<8x8xf32>
    %144 = tpu.matmul %143, %129, %cst_51 {dimension_numbers = #tpu.dot_dimension_numbers<[1], [0], [0], [1], [0, 0, 1, 1], [], []>} : vector<8x8xbf16>, vector<8x8xbf16>, vector<8x8xf32> -> vector<8x8xf32>
    %145 = arith.truncf %144 : vector<8x8xf32> to vector<8x8xbf16>
    %c0_52 = arith.constant 0 : index
    %c3 = arith.constant 3 : index
    %c0_53 = arith.constant 0 : index
    %c0_54 = arith.constant 0 : index
    %146 = vector.load %arg7[%c0_52, %c3, %c0_53, %c0_54] : memref<1x4x8x32xbf16, #tpu.memory_space<vmem>>, vector<1x1x8x32xbf16>
    %147 = vector.shape_cast %146 : vector<1x1x8x32xbf16> to vector<8x32xbf16>
    %cst_55 = arith.constant dense<0.000000e+00> : vector<8x32xf32>
    %148 = tpu.matmul %145, %147, %cst_55 {dimension_numbers = #tpu.dot_dimension_numbers<[1], [0], [0], [1], [0, 0, 1, 1], [], []>} : vector<8x8xbf16>, vector<8x32xbf16>, vector<8x32xf32> -> vector<8x32xf32>
    %149 = arith.addf %123, %148 : vector<8x32xf32>
    %150 = arith.addf %4, %149 : vector<8x32xf32>
    %c0_56 = arith.constant 0 : index
    %c0_57 = arith.constant 0 : index
    %c0_58 = arith.constant 0 : index
    %151 = vector.load %arg8[%c0_56, %c0_57, %c0_58] : memref<1x1x32xf32, #tpu.memory_space<vmem>>, vector<1x1x32xf32>
    %152 = vector.shape_cast %151 : vector<1x1x32xf32> to vector<1x32xf32>
    %153 = vector.broadcast %152 : vector<1x32xf32> to vector<8x32xf32>
    %154 = arith.addf %150, %153 : vector<8x32xf32>
    %c0_59 = arith.constant 0 : index
    %c0_60 = arith.constant 0 : index
    %c0_61 = arith.constant 0 : index
    %155 = vector.load %arg9[%c0_59, %c0_60, %c0_61] : memref<1x1x32xf32, #tpu.memory_space<vmem>>, vector<1x1x32xf32>
    %156 = vector.shape_cast %155 : vector<1x1x32xf32> to vector<1x32xf32>
    %c0_62 = arith.constant 0 : index
    %c0_63 = arith.constant 0 : index
    %c0_64 = arith.constant 0 : index
    %157 = vector.load %arg10[%c0_62, %c0_63, %c0_64] : memref<1x1x32xf32, #tpu.memory_space<vmem>>, vector<1x1x32xf32>
    %158 = vector.shape_cast %157 : vector<1x1x32xf32> to vector<1x32xf32>
    %cst_65 = arith.constant dense<0.000000e+00> : vector<8xf32>
    %159 = vector.multi_reduction <add>, %154, %cst_65 [1] : vector<8x32xf32> to vector<8xf32>
    %160 = vector.shape_cast %159 : vector<8xf32> to vector<8x1xf32>
    %cst_66 = arith.constant 3.200000e+01 : f32
    %161 = vector.broadcast %cst_66 : f32 to vector<8x1xf32>
    %162 = arith.divf %160, %161 : vector<8x1xf32>
    %163 = vector.broadcast %162 : vector<8x1xf32> to vector<8x32xf32>
    %164 = arith.subf %154, %163 : vector<8x32xf32>
    %165 = arith.mulf %164, %164 : vector<8x32xf32>
    %cst_67 = arith.constant dense<0.000000e+00> : vector<8xf32>
    %166 = vector.multi_reduction <add>, %165, %cst_67 [1] : vector<8x32xf32> to vector<8xf32>
    %167 = vector.shape_cast %166 : vector<8xf32> to vector<8x1xf32>
    %cst_68 = arith.constant 3.200000e+01 : f32
    %168 = vector.broadcast %cst_68 : f32 to vector<8x1xf32>
    %169 = arith.divf %167, %168 : vector<8x1xf32>
    %170 = vector.broadcast %162 : vector<8x1xf32> to vector<8x32xf32>
    %171 = arith.subf %154, %170 : vector<8x32xf32>
    %cst_69 = arith.constant 9.99999974E-6 : f32
    %172 = vector.broadcast %cst_69 : f32 to vector<8x1xf32>
    %173 = arith.addf %169, %172 : vector<8x1xf32>
    %174 = math.rsqrt %173 : vector<8x1xf32>
    %175 = vector.broadcast %174 : vector<8x1xf32> to vector<8x32xf32>
    %176 = arith.mulf %171, %175 : vector<8x32xf32>
    %177 = vector.broadcast %156 : vector<1x32xf32> to vector<8x32xf32>
    %178 = arith.mulf %176, %177 : vector<8x32xf32>
    %179 = vector.broadcast %158 : vector<1x32xf32> to vector<8x32xf32>
    %180 = arith.addf %178, %179 : vector<8x32xf32>
    %181 = arith.truncf %180 : vector<8x32xf32> to vector<8x32xbf16>
    %c0_70 = arith.constant 0 : index
    %c0_71 = arith.constant 0 : index
    %c0_72 = arith.constant 0 : index
    %182 = vector.load %arg11[%c0_70, %c0_71, %c0_72] : memref<1x32x128xbf16, #tpu.memory_space<vmem>>, vector<1x32x128xbf16>
    %183 = vector.shape_cast %182 : vector<1x32x128xbf16> to vector<32x128xbf16>
    %cst_73 = arith.constant dense<0.000000e+00> : vector<8x128xf32>
    %184 = tpu.matmul %181, %183, %cst_73 {dimension_numbers = #tpu.dot_dimension_numbers<[1], [0], [0], [1], [0, 0, 1, 1], [], []>} : vector<8x32xbf16>, vector<32x128xbf16>, vector<8x128xf32> -> vector<8x128xf32>
    %c0_74 = arith.constant 0 : index
    %c0_75 = arith.constant 0 : index
    %c0_76 = arith.constant 0 : index
    %185 = vector.load %arg12[%c0_74, %c0_75, %c0_76] : memref<1x1x128xf32, #tpu.memory_space<vmem>>, vector<1x1x128xf32>
    %186 = vector.shape_cast %185 : vector<1x1x128xf32> to vector<1x128xf32>
    %187 = vector.broadcast %186 : vector<1x128xf32> to vector<8x128xf32>
    %188 = arith.addf %184, %187 : vector<8x128xf32>
    %cst_77 = arith.constant 5.000000e-01 : f32
    %189 = vector.broadcast %cst_77 : f32 to vector<8x128xf32>
    %190 = arith.mulf %189, %188 : vector<8x128xf32>
    %cst_78 = arith.constant 0.707106769 : f32
    %191 = vector.broadcast %cst_78 : f32 to vector<8x128xf32>
    %192 = arith.mulf %188, %191 : vector<8x128xf32>
    %193 = math.erf %192 : vector<8x128xf32>
    %cst_79 = arith.constant 1.000000e+00 : f32
    %194 = vector.broadcast %cst_79 : f32 to vector<8x128xf32>
    %195 = arith.addf %194, %193 : vector<8x128xf32>
    %196 = arith.mulf %190, %195 : vector<8x128xf32>
    %197 = arith.truncf %196 : vector<8x128xf32> to vector<8x128xbf16>
    %c0_80 = arith.constant 0 : index
    %c0_81 = arith.constant 0 : index
    %c0_82 = arith.constant 0 : index
    %198 = vector.load %arg13[%c0_80, %c0_81, %c0_82] : memref<1x128x32xbf16, #tpu.memory_space<vmem>>, vector<1x128x32xbf16>
    %199 = vector.shape_cast %198 : vector<1x128x32xbf16> to vector<128x32xbf16>
    %cst_83 = arith.constant dense<0.000000e+00> : vector<8x32xf32>
    %200 = tpu.matmul %197, %199, %cst_83 {dimension_numbers = #tpu.dot_dimension_numbers<[1], [0], [0], [1], [0, 0, 1, 1], [], []>} : vector<8x128xbf16>, vector<128x32xbf16>, vector<8x32xf32> -> vector<8x32xf32>
    %c0_84 = arith.constant 0 : index
    %c0_85 = arith.constant 0 : index
    %c0_86 = arith.constant 0 : index
    %201 = vector.load %arg14[%c0_84, %c0_85, %c0_86] : memref<1x1x32xf32, #tpu.memory_space<vmem>>, vector<1x1x32xf32>
    %202 = vector.shape_cast %201 : vector<1x1x32xf32> to vector<1x32xf32>
    %203 = vector.broadcast %202 : vector<1x32xf32> to vector<8x32xf32>
    %204 = arith.addf %200, %203 : vector<8x32xf32>
    %205 = arith.addf %154, %204 : vector<8x32xf32>
    %c0_87 = arith.constant 0 : index
    %c0_88 = arith.constant 0 : index
    %c0_89 = arith.constant 0 : index
    %206 = vector.load %arg15[%c0_87, %c0_88, %c0_89] : memref<1x8x32xf32, #tpu.memory_space<vmem>>, vector<1x8x32xf32>
    %207 = vector.shape_cast %206 : vector<1x8x32xf32> to vector<8x32xf32>
    %208 = vector.shape_cast %205 : vector<8x32xf32> to vector<1x8x32xf32>
    tpu.vector_store %arg15[%c0_87, %c0_88, %c0_89], %208 {strides = array<i32>} : memref<1x8x32xf32, #tpu.memory_space<vmem>>, vector<1x8x32xf32>,
    return
  }
  func.func @transform_0(%arg0: i32, %arg1: i32) -> (i32, i32, i32) {
    %c0_i32 = arith.constant 0 : i32
    %c0_i32_0 = arith.constant 0 : i32
    %c0_i32_1 = arith.constant 0 : i32
    return %arg0, %c0_i32, %c0_i32_0 : i32, i32, i32
  }
  func.func @transform_1(%arg0: i32, %arg1: i32) -> (i32, i32, i32) {
    %c0_i32 = arith.constant 0 : i32
    %c0_i32_0 = arith.constant 0 : i32
    %c0_i32_1 = arith.constant 0 : i32
    return %arg1, %c0_i32, %c0_i32_0 : i32, i32, i32
  }
  func.func @transform_2(%arg0: i32, %arg1: i32) -> (i32, i32, i32) {
    %c0_i32 = arith.constant 0 : i32
    %c0_i32_0 = arith.constant 0 : i32
    %c0_i32_1 = arith.constant 0 : i32
    return %arg1, %c0_i32, %c0_i32_0 : i32, i32, i32
  }
  func.func @transform_3(%arg0: i32, %arg1: i32) -> (i32, i32, i32) {
    %c0_i32 = arith.constant 0 : i32
    %c0_i32_0 = arith.constant 0 : i32
    %c0_i32_1 = arith.constant 0 : i32
    return %arg1, %c0_i32, %c0_i32_0 : i32, i32, i32
  }
  func.func @transform_4(%arg0: i32, %arg1: i32) -> (i32, i32, i32) {
    %c0_i32 = arith.constant 0 : i32
    %c0_i32_0 = arith.constant 0 : i32
    %c0_i32_1 = arith.constant 0 : i32
    return %arg1, %c0_i32, %c0_i32_0 : i32, i32, i32
  }
  func.func @transform_5(%arg0: i32, %arg1: i32) -> (i32, i32, i32, i32) {
    %c0_i32 = arith.constant 0 : i32
    %c0_i32_0 = arith.constant 0 : i32
    %c0_i32_1 = arith.constant 0 : i32
    %c0_i32_2 = arith.constant 0 : i32
    return %arg1, %c0_i32, %c0_i32_0, %c0_i32_1 : i32, i32, i32, i32
  }
  func.func @transform_6(%arg0: i32, %arg1: i32) -> (i32, i32, i32) {
    %c0_i32 = arith.constant 0 : i32
    %c0_i32_0 = arith.constant 0 : i32
    %c0_i32_1 = arith.constant 0 : i32
    return %arg1, %c0_i32, %c0_i32_0 : i32, i32, i32
  }
  func.func @transform_7(%arg0: i32, %arg1: i32) -> (i32, i32, i32) {
    %c0_i32 = arith.constant 0 : i32
    %c0_i32_0 = arith.constant 0 : i32
    %c0_i32_1 = arith.constant 0 : i32
    return %arg1, %c0_i32, %c0_i32_0 : i32, i32, i32
  }
  func.func @transform_8(%arg0: i32, %arg1: i32) -> (i32, i32, i32) {
    %c0_i32 = arith.constant 0 : i32
    %c0_i32_0 = arith.constant 0 : i32
    %c0_i32_1 = arith.constant 0 : i32
    return %arg1, %c0_i32, %c0_i32_0 : i32, i32, i32
  }
  func.func @transform_9(%arg0: i32, %arg1: i32) -> (i32, i32, i32) {
    %c0_i32 = arith.constant 0 : i32
    %c0_i32_0 = arith.constant 0 : i32
    %c0_i32_1 = arith.constant 0 : i32
    return %arg1, %c0_i32, %c0_i32_0 : i32, i32, i32
  }
  func.func @transform_10(%arg0: i32, %arg1: i32) -> (i32, i32, i32) {
    %c0_i32 = arith.constant 0 : i32
    %c0_i32_0 = arith.constant 0 : i32
    %c0_i32_1 = arith.constant 0 : i32
    return %arg1, %c0_i32, %c0_i32_0 : i32, i32, i32
  }
  func.func @transform_11(%arg0: i32, %arg1: i32) -> (i32, i32, i32) {
    %c0_i32 = arith.constant 0 : i32
    %c0_i32_0 = arith.constant 0 : i32
    %c0_i32_1 = arith.constant 0 : i32
    return %arg1, %c0_i32, %c0_i32_0 : i32, i32, i32
  }
  func.func @transform_12(%arg0: i32, %arg1: i32) -> (i32, i32, i32) {
    %c0_i32 = arith.constant 0 : i32
    %c0_i32_0 = arith.constant 0 : i32
    %c0_i32_1 = arith.constant 0 : i32
    return %arg1, %c0_i32, %c0_i32_0 : i32, i32, i32
  }
  func.func @transform_13(%arg0: i32, %arg1: i32) -> (i32, i32, i32) {
    %c0_i32 = arith.constant 0 : i32
    %c0_i32_0 = arith.constant 0 : i32
    %c0_i32_1 = arith.constant 0 : i32
    return %arg0, %c0_i32, %c0_i32_0 : i32, i32, i32
  }
}

module attributes {stable_mosaic.version = 11 : i64} {
  func.func @_head_kernel(%arg0: i32, %arg1: memref<2x32xf32, #tpu.memory_space<vmem>>, %arg2: memref<1x32xf32, #tpu.memory_space<vmem>>, %arg3: memref<1x32xf32, #tpu.memory_space<vmem>>, %arg4: memref<32x128xbf16, #tpu.memory_space<vmem>>, %arg5: memref<2x128xf32, #tpu.memory_space<vmem>>) attributes {dimension_semantics = [#tpu.dimension_semantics<arbitrary>], iteration_bounds = array<i64: 1>, scalar_prefetch = 0 : i64, scratch_operands = 0 : i64, tpu.core_type = #tpu.core_type<tc>, window_params = [{pipeline_mode = #tpu.pipeline_mode<synchronous>, transform_indices = @transform_0, window_bounds = array<i64: 2, 32>}, {pipeline_mode = #tpu.pipeline_mode<synchronous>, transform_indices = @transform_1, window_bounds = array<i64: 1, 32>}, {pipeline_mode = #tpu.pipeline_mode<synchronous>, transform_indices = @transform_2, window_bounds = array<i64: 1, 32>}, {pipeline_mode = #tpu.pipeline_mode<synchronous>, transform_indices = @transform_3, window_bounds = array<i64: 32, 128>}, {pipeline_mode = #tpu.pipeline_mode<synchronous>, transform_indices = @transform_4, window_bounds = array<i64: 2, 128>}]} {
    %c0 = arith.constant 0 : index
    %c0_0 = arith.constant 0 : index
    %0 = vector.load %arg1[%c0, %c0_0] : memref<2x32xf32, #tpu.memory_space<vmem>>, vector<2x32xf32>
    %c0_1 = arith.constant 0 : index
    %c0_2 = arith.constant 0 : index
    %1 = vector.load %arg2[%c0_1, %c0_2] : memref<1x32xf32, #tpu.memory_space<vmem>>, vector<1x32xf32>
    %c0_3 = arith.constant 0 : index
    %c0_4 = arith.constant 0 : index
    %2 = vector.load %arg3[%c0_3, %c0_4] : memref<1x32xf32, #tpu.memory_space<vmem>>, vector<1x32xf32>
    %cst = arith.constant dense<0.000000e+00> : vector<2xf32>
    %3 = vector.multi_reduction <add>, %0, %cst [1] : vector<2x32xf32> to vector<2xf32>
    %4 = vector.shape_cast %3 : vector<2xf32> to vector<2x1xf32>
    %cst_5 = arith.constant 3.200000e+01 : f32
    %5 = vector.broadcast %cst_5 : f32 to vector<2x1xf32>
    %6 = arith.divf %4, %5 : vector<2x1xf32>
    %7 = vector.broadcast %6 : vector<2x1xf32> to vector<2x32xf32>
    %8 = arith.subf %0, %7 : vector<2x32xf32>
    %9 = arith.mulf %8, %8 : vector<2x32xf32>
    %cst_6 = arith.constant dense<0.000000e+00> : vector<2xf32>
    %10 = vector.multi_reduction <add>, %9, %cst_6 [1] : vector<2x32xf32> to vector<2xf32>
    %11 = vector.shape_cast %10 : vector<2xf32> to vector<2x1xf32>
    %cst_7 = arith.constant 3.200000e+01 : f32
    %12 = vector.broadcast %cst_7 : f32 to vector<2x1xf32>
    %13 = arith.divf %11, %12 : vector<2x1xf32>
    %14 = vector.broadcast %6 : vector<2x1xf32> to vector<2x32xf32>
    %15 = arith.subf %0, %14 : vector<2x32xf32>
    %cst_8 = arith.constant 9.99999974E-6 : f32
    %16 = vector.broadcast %cst_8 : f32 to vector<2x1xf32>
    %17 = arith.addf %13, %16 : vector<2x1xf32>
    %18 = math.rsqrt %17 : vector<2x1xf32>
    %19 = vector.broadcast %18 : vector<2x1xf32> to vector<2x32xf32>
    %20 = arith.mulf %15, %19 : vector<2x32xf32>
    %21 = vector.broadcast %1 : vector<1x32xf32> to vector<2x32xf32>
    %22 = arith.mulf %20, %21 : vector<2x32xf32>
    %23 = vector.broadcast %2 : vector<1x32xf32> to vector<2x32xf32>
    %24 = arith.addf %22, %23 : vector<2x32xf32>
    %25 = arith.mulf %24, %24 : vector<2x32xf32>
    %cst_9 = arith.constant dense<0.000000e+00> : vector<2xf32>
    %26 = vector.multi_reduction <add>, %25, %cst_9 [1] : vector<2x32xf32> to vector<2xf32>
    %27 = vector.shape_cast %26 : vector<2xf32> to vector<2x1xf32>
    %cst_10 = arith.constant 1.000000e-24 : f32
    %28 = vector.broadcast %cst_10 : f32 to vector<2x1xf32>
    %29 = arith.maximumf %27, %28 : vector<2x1xf32>
    %30 = math.rsqrt %29 : vector<2x1xf32>
    %31 = vector.broadcast %30 : vector<2x1xf32> to vector<2x32xf32>
    %32 = arith.mulf %24, %31 : vector<2x32xf32>
    %33 = arith.truncf %32 : vector<2x32xf32> to vector<2x32xbf16>
    %c0_11 = arith.constant 0 : index
    %c0_12 = arith.constant 0 : index
    %34 = vector.load %arg4[%c0_11, %c0_12] : memref<32x128xbf16, #tpu.memory_space<vmem>>, vector<32x128xbf16>
    %cst_13 = arith.constant dense<0.000000e+00> : vector<2x128xf32>
    %35 = tpu.matmul %33, %34, %cst_13 {dimension_numbers = #tpu.dot_dimension_numbers<[1], [0], [0], [1], [0, 0, 1, 1], [], []>} : vector<2x32xbf16>, vector<32x128xbf16>, vector<2x128xf32> -> vector<2x128xf32>
    %c0_14 = arith.constant 0 : index
    %c0_15 = arith.constant 0 : index
    %36 = vector.load %arg5[%c0_14, %c0_15] : memref<2x128xf32, #tpu.memory_space<vmem>>, vector<2x128xf32>
    tpu.vector_store %arg5[%c0_14, %c0_15], %35 {strides = array<i32>} : memref<2x128xf32, #tpu.memory_space<vmem>>, vector<2x128xf32>,
    return
  }
  func.func @transform_0(%arg0: i32) -> (i32, i32) {
    %c0_i32 = arith.constant 0 : i32
    %c0_i32_0 = arith.constant 0 : i32
    %c0_i32_1 = arith.constant 0 : i32
    return %c0_i32, %c0_i32_0 : i32, i32
  }
  func.func @transform_1(%arg0: i32) -> (i32, i32) {
    %c0_i32 = arith.constant 0 : i32
    %c0_i32_0 = arith.constant 0 : i32
    %c0_i32_1 = arith.constant 0 : i32
    return %c0_i32, %c0_i32_0 : i32, i32
  }
  func.func @transform_2(%arg0: i32) -> (i32, i32) {
    %c0_i32 = arith.constant 0 : i32
    %c0_i32_0 = arith.constant 0 : i32
    %c0_i32_1 = arith.constant 0 : i32
    return %c0_i32, %c0_i32_0 : i32, i32
  }
  func.func @transform_3(%arg0: i32) -> (i32, i32) {
    %c0_i32 = arith.constant 0 : i32
    %c0_i32_0 = arith.constant 0 : i32
    %c0_i32_1 = arith.constant 0 : i32
    return %c0_i32, %c0_i32_0 : i32, i32
  }
  func.func @transform_4(%arg0: i32) -> (i32, i32) {
    %c0_i32 = arith.constant 0 : i32
    %c0_i32_0 = arith.constant 0 : i32
    %c0_i32_1 = arith.constant 0 : i32
    return %c0_i32, %c0_i32_0 : i32, i32
  }
}

</mosaic_0001>

<bundles_post_ra>
// kernel: vit_forward.5
= control target key start
LH: loop header
LB: loop body
LE: loop exit
PB: predicated region body
PF: predicated region fallthrough
CT: control target
= control target key end

     0   :  { %vm22_vm0 = vcmask 254976   ;;  %s230_s0 = inlined_call_operand.vmem [shape: f32[2,32], index: 0, kind: input, shape index: {}]   ;;  %s231_s1 = inlined_call_operand.vmem [shape: f32[1,32], index: 1, kind: input, shape index: {}]   ;;  %s232_s2 = inlined_call_operand.vmem [shape: f32[1,32], index: 2, kind: input, shape index: {}]   ;;  %s233_s3 = inlined_call_operand.vmem [shape: bf16[32,128], index: 3, kind: input, shape index: {}]   ;;  %s234_s4 = inlined_call_operand.hbm [shape: f32[2,128], index: 4, kind: output, shape index: {}]  }
   0x1   :  { %v19_v0 = vld [vmem:[%s230_s0] sm:$0x3] }
   0x2   :  { %v23_v1 = vsel %vm22_vm0, %v19_v0, 0.0 }
   0x3   :  { %24 = vadd.xlane.f32.xlu0 %v23_v1 }
   0x4   :  { %9 = vsyncpa [#allocation3], 0  ;;  %v134_v11 = vld [vmem:[%s231_s1] ss:$0 sm:$0xff]  ;;  %v153_v18 = vld [vmem:[%s233_s3 + $0x8] sm:$0xff]   ;;  %v181_v19 = vmov 0.0  }
   0x5   :  { %v135_v13 = vld [vmem:[%s232_s2] ss:$0 sm:$0xff]  ;;  %142 = vmatprep.subr.bf16.mxu0 %v181_v19  ;;  %vm182_vm1 = vmmov 0   ;;  %vm75_vm2 = vcmask 261120   ;;  %s183_s2 = smov [#allocation2]  }
   0x6   :  { %146 = vmatprep.mubr.msk.bf16.mxu0 %vm182_vm1, %v181_v19  ;;  %143 = vmatpush3.bf16.msra.mxu0 %v153_v18  ;;  %v154_v20 = vld [vmem:[%s233_s3] sm:$0xff]   ;;  %s126_s23 = sshll.u32 %s183_s2, 4  ;;  %s127_s23 = int_to_ptr.vmem [resolvable:$true] %s126_s23 }
   0x7   :  { %144 = vmatprep.subr.bf16.mxu0 %v181_v19  ;;  %s159_s24 = scalar_lea.vmem %s127_s23, 32  ;;  %p164_p1 = scmp.lt.s32.totalorder %s127_s23, %s127_s23 }
   0x8   :  { %p160_p0 = scmp.ne.s32.totalorder %s127_s23, %s159_s24  ;;  %p165_p2 = scmp.lt.s32.totalorder %s159_s24, %s159_s24 }
   0xa   :  { %145 = vmatpush3.bf16.msra.mxu0 %v154_v20  ;;  %p166_p3 = por %p165_p2, %p164_p1 }
   0xc   :  { %p167_p4 = pnand %p166_p3, %p160_p0 }
  0x8c   :  { %v25_v2 = vpop.xlane.xlu0 %24 }
  0x8d   :  { %v27_v3 = vmul.f32 0.03125, %v25_v2 }
  0x8f   :  { %v28_v4 = vsub.f32 %v19_v0, %v27_v3 }
  0x91   :  { %v29_v5 = vmul.f32 %v28_v4, %v28_v4 }
  0x93   :  { %v30_v6 = vsel %vm22_vm0, %v29_v5, 0.0 }
  0x94   :  { %31 = vadd.xlane.f32.xlu0 %v30_v6 }
 0x11d   :  { %v32_v7 = vpop.xlane.xlu0 %31 }
 0x11e   :  { %v33_v8 = vmul.f32 0.03125, %v32_v7 }
 0x120   :  { %v34_v9 = vadd.f32 1e-05, %v33_v8 }
 0x122   :  { %155 = vrsqrt.f32 %v34_v9 }
 0x12f   :  { %v156_v10 = vpop.eup %155 }
 0x130   :  { %v36_v12 = vmul.f32 %v156_v10, %v28_v4 }
 0x132   :  { %v43_v14 = vmul.f32 %v134_v11, %v36_v12 }
 0x134   :  { %v50_v15 = vadd.f32 %v135_v13, %v43_v14 }
 0x136   :  { %v51_v16 = vmul.f32 %v50_v15, %v50_v15 }
 0x138   :  { %v52_v17 = vsel %vm22_vm0, %v51_v16, 0.0 }
 0x139   :  { %53 = vadd.xlane.f32.xlu1 %v52_v17 }
 0x1c2   :  { %v54_v21 = vpop.xlane.xlu1 %53 }
 0x1c3   :  { %v55_v22 = vmax.f32 %v54_v21, 1e-24 }
 0x1c5   :  { %157 = vrsqrt.f32 %v55_v22 }
 0x1d2   :  { %v158_v23 = vpop.eup %157 }
 0x1d3   :  { %v57_v24 = vmul.f32 %v158_v23, %v50_v15 }
 0x1d5   :  { %v58_v25 = vpack.c.bf16 %v57_v24, %v57_v24 }
 0x1d7   :  { %147 = vmatmul.mubr.msk.bf16.vlgmr.msra.gmra.mxu0 %vm75_vm2, %v58_v25 }
 0x297   :  { %v113_v26 = vpop.f32.mrf.mxu0 }
 0x298   :  { %119 = vst [vmem:[#allocation2] sm:$0x3] %v113_v26 }
 0x299   :  { %v148_v27 = vpop.f32.mrf.mxu0 }
 0x29a   :  { %170 = shalt.err (!%p167_p4)
}
 0x29b   :  { %129 = dma.vmem_to_hbm [thread:$0]  %s127_s23, 32, %s234_s4, [#allocation3]   ;;  %v116_v28 = vpop.f32.mrf.mxu0 }
 0x29d   :  { %v149_v29 = vpop.f32.mrf.mxu0 }
 0x29e   :  { %179 = dma.done.wait [#allocation3], 32  }
 0x29f   :  { %180 = vsyncadd [#allocation3], 4294967264 }
 0x2a0   :  { %133 = vsyncpa [#allocation3], 1 }

// kernel: vit_forward.3
= control target key start
LH: loop header
LB: loop body
LE: loop exit
PB: predicated region body
PF: predicated region fallthrough
CT: control target
= control target key end

     0   :  { %s588_s18 = smov 0   ;;  %s667_s0 = inlined_call_operand.vmem [shape: bf16[2,4,256], index: 0, kind: input, shape index: {}]   ;;  %s668_s1 = inlined_call_operand.vmem [shape: bf16[256,32], index: 1, kind: input, shape index: {}]   ;;  %s669_s2 = inlined_call_operand.vmem [shape: f32[1,32], index: 2, kind: input, shape index: {}]   ;;  %s670_s3 = inlined_call_operand.vmem [shape: f32[4,32], index: 3, kind: input, shape index: {}]   ;;  %s671_s4 = inlined_call_operand.vmem [shape: f32[1,32], index: 4, kind: input, shape index: {}]   ;;  %s672_s5 = inlined_call_operand.vmem [shape: f32[2,8,32], index: 5, kind: output, shape index: {}]  }
   0x1 LB: > { %s473_s19 = sadd.s32 4294967295, %s555_s18   ;;  %p477_p0 = scmp.ge.s32.totalorder %s555_s18, 1  ;;  %s555_s18 = sphi %s588_s18, %s15_s18  }
   0x2   : > { %p187_p1 = scmp.lt.s32.totalorder %s555_s18, 3 }
   0x4   : > { %p188_p2 = pnand %p477_p0, %p187_p1 }
   0x5   : > { %p214_p3 = scmp.lt.s32.totalorder (!%p188_p2), %s473_s19, 1 }
   0x6   : > { %191 = sbr.rel (%p188_p2) target bundleno = 246 (0xf6), region = 40 }
   0xb   : > { %v533_v0 = vld [vmem:[%s668_s1 + $0x78] sm:$0xff]   ;;  %v535_v2 = vld [vmem:[%s668_s1 + $0x70] sm:$0xff]   ;;  %s674_s19 = smov (!%p214_p3, %s473_s19), 1  ;;  %v537_v4 = vld [vmem:[%s668_s1 + $0x68] sm:$0xff]   ;;  %vm418_vm0 = vcmask 256000   ;;  %v557_v6 = vmov 0.0  }
   0xc   : > { %v534_v1 = vld [vmem:[%s668_s1 + $0x38] sm:$0xff]   ;;  %502 = vmatprep.subr.bf16.mxu0 %v533_v0  ;;  %v536_v3 = vld [vmem:[%s668_s1 + $0x30] sm:$0xff]   ;;  %s480_s30 = sshll.u32 %s674_s19, 3  ;;  %v538_v5 = vld [vmem:[%s668_s1 + $0x28] sm:$0xff]   ;;  %s501_s13 = sshll.u32 %s674_s19, 2  ;;  %vm416_vm1 = vcmask 253952  }
   0xd   : > { %503 = vmatpush3.bf16.msra.mxu0 %v534_v1  ;;  %s614_s8 = scalar_lea.vmem %s672_s5, %s480_s30  ;;  %v539_v7 = vld [vmem:[%s668_s1 + $0x60] sm:$0xff]   ;;  %v541_v9 = vld [vmem:[%s668_s1 + $0x58] sm:$0xff]   ;;  %s218_s22 = scalar_lea.vmem %s667_s0, %s501_s13  ;;  %v543_v11 = vld [vmem:[%s668_s1 + $0x50] sm:$0xff]   ;;  %vm413_vm2 = vcmask 257024  }
   0xe   : > { %504 = vmatprep.subr.bf16.mxu0 %v535_v2  ;;  %419 = vst.msk [vmem:[%s614_s8 + $0x5] sm:$0x7] %vm418_vm0, %v557_v6  ;;  %v540_v8 = vld [vmem:[%s668_s1 + $0x20] sm:$0xff]   ;;  %v542_v10 = vld [vmem:[%s668_s1 + $0x18] sm:$0xff]   ;;  %v544_v15 = vld [vmem:[%s668_s1 + $0x10] sm:$0xff]  }
   0xf   : > { %v482_v12 = vld.sshfl [vmem:[%s218_s22] sm:$0x33 pattern:$0x76325410]  ;;  %v545_v16 = vld [vmem:[%s668_s1 + $0x48] sm:$0xff]  }
  0x10   : > { %v415_v13 = vld [vmem:[%s671_s4] sm:$0x1]  ;;  %v272_v14 = vcombine.high %v482_v12, %v482_v12  ;;  %v546_v17 = vld [vmem:[%s668_s1 + $0x8] sm:$0xff]  }
  0x11   : > { %505 = vmatpush3.bf16.msra.mxu0 %v536_v3  ;;  %417 = vst.msk [vmem:[%s614_s8 + $0x4] sm:$0x1] %vm416_vm1, %v415_v13  ;;  %v547_v18 = vld [vmem:[%s668_s1 + $0x40] sm:$0xff]  }
  0x12   : > { %506 = vmatprep.subr.bf16.mxu0 %v537_v4  ;;  %403 = vmatprep.mubr.bf16.mxu0 %v272_v14  ;;  %v548_v19 = vld [vmem:[%s668_s1] sm:$0xff]  }
  0x13   : > { %v481_v21 = vld [vmem:[%s669_s2] ss:$0 sm:$0xff] }
  0x14   : > { %v411_v24 = vld [vmem:[%s670_s3] sm:$0xf] }
  0x15   : > { %507 = vmatpush3.bf16.msra.mxu0 %v538_v5 }
  0x16   : > { %508 = vmatprep.subr.bf16.mxu0 %v539_v7 }
  0x19   : > { %509 = vmatpush3.bf16.msra.mxu0 %v540_v8 }
  0x1a   : > { %510 = vmatprep.subr.bf16.mxu0 %v541_v9 }
  0x1d   : > { %511 = vmatpush3.bf16.msra.mxu0 %v542_v10 }
  0x1e   : > { %512 = vmatprep.subr.bf16.mxu0 %v543_v11 }
  0x21   : > { %513 = vmatpush3.bf16.msra.mxu0 %v544_v15 }
  0x22   : > { %514 = vmatprep.subr.bf16.mxu0 %v545_v16 }
  0x25   : > { %515 = vmatpush3.bf16.msra.mxu0 %v546_v17 }
  0x26   : > { %516 = vmatprep.subr.bf16.mxu0 %v547_v18 }
  0x29   : > { %517 = vmatpush3.bf16.msra.mxu0 %v548_v19 }
  0x2c   : > { %404 = vmatmul.mubr.bf16.vlgmr.msra.gmra.mxu0 %v482_v12 }
  0xec   : > { %v518_v20 = vpop.f32.mrf.mxu0 }
  0xee   : > { %v519_v22 = vpop.f32.mrf.mxu0 }
  0xef   : > { %v520_v23 = vadd.f32 %v519_v22, %v518_v20 }
  0xf0   : > { %v521_v25 = vpop.f32.mrf.mxu0 }
  0xf1   : > { %v406_v26 = vadd.f32 %v520_v23, %v481_v21 }
  0xf2   : > { %v522_v27 = vpop.f32.mrf.mxu0 }
  0xf3   : > { %v412_v28 = vadd.f32 %v411_v24, %v406_v26 }
  0xf5   : > { %414 = vst.msk [vmem:[%s614_s8] sm:$0xf] %vm413_vm2, %v412_v28 }
  0xf6 PF: > { %s15_s18 = sadd.s32 1, %s555_s18  }
  0xf7   : > { %p12_p4 = scmp.ge.s32.totalorder %s15_s18, 4  }
  0xf9   :  { %14 = sbr.rel (!%p12_p4) target bundleno = 1 (0x1), region = 70 }

// kernel: vit_forward.4
= control target key start
LH: loop header
LB: loop body
LE: loop exit
PB: predicated region body
PF: predicated region fallthrough
CT: control target
= control target key end

     0   :  { %s2216_s25 = smov 0   ;;  %s2218_s26 = smov 0   ;;  %s2518_s0 = inlined_call_operand.vmem [shape: f32[2,8,32], index: 0, kind: input, shape index: {}, may-alias: {0,13}]   ;;  %s2519_s1 = inlined_call_operand.vmem [shape: f32[2,1,32], index: 1, kind: input, shape index: {}]   ;;  %s2520_s2 = inlined_call_operand.vmem [shape: f32[2,1,32], index: 2, kind: input, shape index: {}]   ;;  %s2521_s3 = inlined_call_operand.vmem [shape: bf16[2,32,96], index: 3, kind: input, shape index: {}]   ;;  %s2522_s4 = inlined_call_operand.vmem [shape: f32[2,1,96], index: 4, kind: input, shape index: {}]   ;;  %s2523_s5 = inlined_call_operand.vmem [shape: bf16[2,4,8,32], index: 5, kind: input, shape index: {}]   ;;  %s2524_s6 = inlined_call_operand.vmem [shape: f32[2,1,32], index: 6, kind: input, shape index: {}]   ;;  %s2525_s7 = inlined_call_operand.vmem [shape: f32[2,1,32], index: 7, kind: input, shape index: {}]   ;;  %s2526_s8 = inlined_call_operand.vmem [shape: f32[2,1,32], index: 8, kind: input, shape index: {}]   ;;  %s2527_s9 = inlined_call_operand.vmem [shape: bf16[2,32,128], index: 9, kind: input, shape index: {}]   ;;  %s2528_s10 = inlined_call_operand.vmem [shape: f32[2,1,128], index: 10, kind: input, shape index: {}]   ;;  %s2529_s11 = inlined_call_operand.vmem [shape: bf16[2,128,32], index: 11, kind: input, shape index: {}]   ;;  %s2530_s12 = inlined_call_operand.vmem [shape: f32[2,1,32], index: 12, kind: input, shape index: {}]   ;;  %s2531_s13 = inlined_call_operand.vmem [shape: f32[2,8,32], index: 13, kind: output, shape index: {}, may-alias: {0,13}]  }
   0x1   :  { %2536 = sst [smem:[#allocation8_spill]] %s2518_s0  ;;  %s2220_s27 = smov 0  }
   0x2   :  { %2537 = sst [smem:[#allocation9_spill]] %s2520_s2  ;;  %s2222_s28 = smov 0  }
   0x3   :  { %2538 = sst [smem:[#allocation10_spill]] %s2521_s3  ;;  %s2224_s29 = smov 0  }
   0x4   :  { %2539 = sst [smem:[#allocation11_spill]] %s2523_s5 }
   0x5   :  { %2540 = sst [smem:[#allocation12_spill]] %s2531_s13 }
   0x6 LB: > { %2541 = sst [smem:[#allocation2_spill]] %s2114_s25  ;;  %s32_s30 = sadd.s32 1, %s2122_s27  ;;  %s2130_s29 = sphi %s2224_s29, %s23_s29   ;;  %s2126_s28 = sphi %s2222_s28, %s2564_s28   ;;  %s2122_s27 = sphi %s2220_s27, %s2563_s27   ;;  %s2118_s26 = sphi %s2218_s26, %s2562_s26   ;;  %s2114_s25 = sphi %s2216_s25, %s2561_s25  }
   0x7   : > { %2542 = sst [smem:[#allocation3_spill]] %s2122_s27  ;;  %s35_s14 = sadd.s32 1, %s2126_s28 }
   0x8   : > { %2543 = sst [smem:[#allocation4_spill]] %s2126_s28  ;;  %p33_p0 = scmp.ge.s32.totalorder %s32_s30, 2 }
   0x9   : > { %2544 = sst [smem:[#allocation5_spill]] %s2130_s29  ;;  %p1802_p1 = scmp.ge.s32.totalorder %s2130_s29, 1 }
   0xa   : > { %p502_p2 = scmp.lt.s32.totalorder %s2130_s29, 5  ;;  %s2566_s30 = smov (%p33_p0, %s32_s30), 0 }
   0xb   : > { %2545 = sst [smem:[#allocation6_spill]] %s2566_s30  ;;  %s2568_s14 = smov (!%p33_p0, %s35_s14), %s2126_s28 }
   0xc   : > { %p503_p3 = pnand %p1802_p1, %p502_p2  ;;  %p37_p4 = scmp.ge.s32.totalorder %s2568_s14, 2 }
   0xd   : > { %p588_p5 = scmp.lt.s32.totalorder (!%p503_p3), %s2118_s26, 1  ;;  %p592_p6 = scmp.lt.s32.totalorder (!%p503_p3), %s2114_s25, 1 }
   0xe   : > { %s2570_s14 = smov (%p37_p4, %s2568_s14), 0  ;;  %506 = sbr.rel (%p503_p3) target bundleno = 4054 (0xfd6), region = 72 }
   0xf   : > { %2546 = sst [smem:[#allocation7_spill]] %s2570_s14 }
  0x10   : > { %s2547_s0 = sld [smem:[#allocation8_spill]] (!%p503_p3) }
  0x11   : > { %s2549_s3 = sld [smem:[#allocation10_spill]] (!%p503_p3) }
  0x12   : > { %s2550_s5 = sld [smem:[#allocation11_spill]] (!%p503_p3) }
  0x13   : > { %s2572_s26 = smov (!%p588_p5, %s2118_s26), 1 }
  0x14   : > { %s2250_s15 = scalar_select %p592_p6, %s2114_s25, 1 }
  0x15   : > { %s1803_s16 = sshll.u32 %s2572_s26, 3 }
  0x16   : > { %s591_s19 = scalar_lea.vmem %s2547_s0, %s1803_s16  ;;  %s1853_s30 = sshll.u32 %s2250_s15, 4 }
  0x17   : > { %s2267_s29 = scalar_lea.vmem %s2549_s3, %s1853_s30  ;;  %s2293_s26 = scalar_lea.vmem %s2527_s9, %s1853_s30 }
  0x18   : > { %s2276_s0 = scalar_lea.vmem %s2550_s5, %s1853_s30  ;;  %s627_s13 = scalar_lea.vmem %s2528_s10, %s2250_s15 }
  0x19   : > { %s1856_s5 = sshll.u32 %s2250_s15, 6  ;;  %s635_s23 = scalar_lea.vmem %s2530_s12, %s2250_s15 }
  0x1a   : > { %s2307_s22 = scalar_lea.vmem %s2529_s11, %s1856_s5  ;;  %s2551_s3 = sld [smem:[#allocation12_spill]] }
  0x1b   : > { %s2552_s30 = sld [smem:[#allocation2_spill]] }
  0x20   : > { %s2312_s2 = scalar_lea.vmem %s2551_s3, %s1803_s16 }
  0x21   : > { %p1813_p7 = scmp.ne.s32.totalorder %s2552_s30, 0 }
  0x23   : > { %644 = sbr.rel (%p1813_p7) target bundleno = 42 (0x2a), region = 76 }
  0x28   : > { %v645_v0 = vld [vmem:[%s591_s19] sm:$0xff]  ;;  %vm646_vm0 = vcmask 261120  }
  0x29   : > { %647 = vst.msk [vmem:[%s2312_s2] sm:$0xff] %vm646_vm0, %v645_v0 }
  0x2a PF: > { %vm651_vm1 = vcmask 261120   ;;  %v2058_v8 = vld [vmem:[%s2267_s29 + $0x8] sm:$0xff]   ;;  %v2132_v9 = vmov 0.0   ;;  %vm2133_vm2 = vmmov 0   ;;  %v2059_v10 = vld [vmem:[%s2267_s29] sm:$0xff]   ;;  %s2553_s29 = scalar_lea.vmem %s2519_s1, %s2250_s15  ;;  %s2554_s25 = sld [smem:[#allocation9_spill]]  ;;  %v747_v32 = vlaneseq }
  0x2b   : > { %1896 = vmatprep.subr.bf16.mxu1 %v2132_v9  ;;  %1900 = vmatprep.mubr.msk.bf16.mxu1 %vm2133_vm2, %v2132_v9  ;;  %v1814_v15 = vld [vmem:[%s2553_s29] ss:$0 sm:$0xff]  ;;  %s2556_s21 = scalar_lea.vmem %s2522_s4, %s2250_s15  ;;  %s2134_s14 = smov 64   ;;  %vm755_vm3 = vcmask 64512   ;;  %vm819_vm4 = vcmask 1043456  }
  0x2c   : > { %1897 = vmatpush3.bf16.msra.mxu1 %v2058_v8  ;;  %1922 = vmatprep.subr.bf16.mxu0 %v2132_v9  ;;  %v1816_v21 = vld [vmem:[%s2556_s21] ss:$0 sm:$0xff]  ;;  %s2135_s24 = smov 96   ;;  %v748_v33 = vand.u32 127, %v747_v32  ;;  %v2136_v34 = vmov -1e+30   ;;  %s2557_s18 = scalar_lea.vmem %s2524_s6, %s2250_s15 }
  0x2d   : > { %1898 = vmatprep.subr.bf16.mxu1 %v2132_v9  ;;  %1924 = vmatprep.mubr.msk.bf16.mxu0 %vm2133_vm2, %v2132_v9  ;;  %s2137_s27 = smov 88   ;;  %s2138_s28 = smov 120   ;;  %v1824_v8 = vld [vmem:[%s2276_s0 + $0x4] sm:$0xf] }
  0x2e   : > { %vm749_vm5 = vcmp.lt.s32.totalorder %v748_v33, 5  ;;  %s2139_s30 = smov 56   ;;  %s2140_s3 = smov 80  }
  0x2f   : > { %v2363_v35 = vsel %vm749_vm5, 0.0, %v2136_v34  ;;  %s2141_s5 = smov 112   ;;  %s2142_s29 = smov 48  }
  0x30   : > { %v2317_v1 = vld [vmem:[%s2312_s2] sm:$0xff]  ;;  %1899 = vmatpush3.bf16.msra.mxu1 %v2059_v10  ;;  %s2555_s17 = scalar_lea.vmem %s2554_s25, %s2250_s15  ;;  %v982_v10 = vsel %vm819_vm4, %v1824_v8, 0  ;;  %s2143_s16 = smov 72  }
  0x31   : > { %v652_v2 = vsel %vm651_vm1, %v2317_v1, 0.0  ;;  %1904 = vmatprep.subr.bf16.mxu1 %v2132_v9  ;;  %v1815_v17 = vld [vmem:[%s2555_s17] ss:$0 sm:$0xff]  ;;  %s2144_s19 = smov 104   ;;  %s2145_s25 = smov 40  }
  0x32   : > { %653 = vadd.xlane.f32.xlu0 %v652_v2  ;;  %s2558_s21 = scalar_lea.vmem %s2525_s7, %s2250_s15 }
  0xbb   : > { %v654_v3 = vpop.xlane.xlu0 %653 }
  0xbc   : > { %v656_v4 = vmul.f32 0.03125, %v654_v3 }
  0xbe   : > { %v657_v5 = vsub.f32 %v2317_v1, %v656_v4 }
  0xc0   : > { %v658_v6 = vmul.f32 %v657_v5, %v657_v5 }
  0xc2   : > { %v659_v7 = vsel %vm651_vm1, %v658_v6, 0.0 }
  0xc3   : > { %660 = vadd.xlane.f32.xlu0 %v659_v7 }
 0x14c   : > { %v661_v11 = vpop.xlane.xlu0 %660 }
 0x14d   : > { %v662_v12 = vmul.f32 0.03125, %v661_v11 }
 0x14f   : > { %v663_v13 = vadd.f32 1e-05, %v662_v12 }
 0x151   : > { %2070 = vrsqrt.f32 %v663_v13  ;;  %v864_v13 = vld [vmem:[%s2276_s0] sm:$0xf] }
 0x15e   : > { %v2071_v14 = vpop.eup %2070 }
 0x15f   : > { %v665_v16 = vmul.f32 %v2071_v14, %v657_v5 }
 0x161   : > { %v672_v18 = vmul.f32 %v1814_v15, %v665_v16  ;;  %v1028_v16 = vsel %vm819_vm4, %v864_v13, 0 }
 0x163   : > { %v679_v19 = vadd.f32 %v1815_v17, %v672_v18 }
 0x165   : > { %v680_v20 = vpack.c.bf16 %v679_v19, %v679_v19 }
 0x167   : > { %1901 = vmatmul.mubr.msk.bf16.vlgmr.msra.gmra.mxu1 %vm651_vm1, %v680_v20 }
 0x168   : > { %1906 = vmatprep.mubr.msk.bf16.mxu1 %vm2133_vm2, %v2132_v9 }
 0x227   : > { %v741_v22 = vpop.f32.mrf.mxu1 }
 0x228   : > { %v742_v23 = vadd.f32 %v1816_v21, %v741_v22 }
 0x229   : > { %v1902_v24 = vpop.f32.mrf.mxu1 }
 0x22a   : > { %v2351_v25 = vpack.c.bf16 %v742_v23, %v742_v23 }
 0x22b   : > { %v744_v26 = vpop.f32.mrf.mxu1 }
 0x22c   : > { %814 = vrot.lane.b32.xlu0 %v2351_v25, %s2134_s14  ;;  %753 = vrot.lane.b32.xlu1 %v2351_v25, %s2135_s24 }
 0x22d   : > { %v1903_v27 = vpop.f32.mrf.mxu1 }
 0x29e   : > { %v754_v28 = vpop.permute.xlu1 %753  ;;  %v815_v30 = vpop.permute.xlu0 %814 }
 0x29f   : > { %v760_v29 = vsel %vm755_vm3, %v754_v28, 0  ;;  %v821_v31 = vsel %vm819_vm4, %v815_v30, 0 }
 0x2a0   : > { %1905 = vmatpush3.bf16.xpose.msra.mxu1 %v760_v29 }
 0x2a1   : > { %1910 = vmatprep.subr.bf16.mxu1 %v2132_v9 }
 0x2a7   : > { %1907 = vmatmul.mubr.msk.bf16.vlgmr.msra.gmra.mxu1 %vm755_vm3, %v2351_v25 }
 0x2a8   : > { %1911 = vmatpush3.bf16.msra.mxu1 %v821_v31  ;;  %1912 = vmatprep.mubr.msk.bf16.mxu1 %vm2133_vm2, %v2132_v9 }
 0x2a9   : > { %1916 = vmatprep.subr.bf16.mxu1 %v2132_v9 }
 0x367   : > { %v796_v36 = vpop.f32.mrf.mxu1 }
 0x368   : > { %v797_v37 = vadd.f32 %v796_v36, %v2363_v35 }
 0x369   : > { %v1908_v38 = vpop.f32.mrf.mxu1 }
 0x36a   : > { %v802_v39 = vsel %vm755_vm3, %v797_v37, -inf }
 0x36b   : > { %803 = vmax.xlane.f32.xlu1 %v802_v39  ;;  %v799_v40 = vpop.f32.mrf.mxu1 }
 0x36d   : > { %v1909_v41 = vpop.f32.mrf.mxu1 }
 0x3f4   : > { %v804_v42 = vpop.xlane.xlu1 %803 }
 0x3f5   : > { %v805_v43 = vsub.f32 %v797_v37, %v804_v42 }
 0x3f7   : > { %v806_v44 = vmul.f32 1.442695, %v805_v43 }
 0x3f9   : > { %2072 = vpow2.f32 %v806_v44 }
 0x406   : > { %v2073_v45 = vpop.eup %2072 }
 0x407   : > { %v808_v46 = vsel %vm755_vm3, %v2073_v45, 0.0 }
 0x408   : > { %809 = vadd.xlane.f32.xlu0 %v808_v46 }
 0x41e   : > { %867 = vrot.lane.b32.xlu0 %v2351_v25, %s2137_s27  ;;  %s2559_s27 = scalar_lea.vmem %s2526_s8, %s2250_s15 }
 0x422   : > { %865 = vrot.lane.b32.xlu0 %v2351_v25, %s2138_s28 }
 0x491   : > { %v810_v47 = vpop.xlane.xlu0 %809 }
 0x492   : > { %2074 = vrcp.f32 %v810_v47 }
 0x495   : > { %v868_v50 = vpop.permute.xlu0 %867 }
 0x496   : > { %v873_v52 = vsel %vm755_vm3, %v868_v50, 0 }
 0x499   : > { %v866_v53 = vpop.permute.xlu0 %865 }
 0x49f   : > { %v2075_v48 = vpop.eup %2074 }
 0x4a0   : > { %v812_v49 = vmul.f32 %v2075_v48, %v2073_v45 }
 0x4a2   : > { %v813_v51 = vpack.c.bf16 %v812_v49, %v812_v49 }
 0x4a4   : > { %1913 = vmatmul.mubr.msk.bf16.vlgmr.msra.gmra.mxu1 %vm755_vm3, %v813_v51 }
 0x4a5   : > { %1917 = vmatpush3.bf16.xpose.msra.mxu1 %v873_v52  ;;  %1918 = vmatprep.mubr.msk.bf16.mxu1 %vm2133_vm2, %v2132_v9 }
 0x4a6   : > { %1928 = vmatprep.subr.bf16.mxu1 %v2132_v9 }
 0x4ac   : > { %1919 = vmatmul.mubr.msk.bf16.vlgmr.msra.gmra.mxu1 %vm755_vm3, %v866_v53 }
 0x4ad   : > { %1930 = vmatprep.mubr.msk.bf16.mxu1 %vm2133_vm2, %v2132_v9  ;;  %1929 = vmatpush3.bf16.msra.mxu1 %v982_v10 }
 0x4ae   : > { %1940 = vmatprep.subr.bf16.mxu1 %v2132_v9 }
 0x564   : > { %v857_v54 = vpop.f32.mrf.mxu1 }
 0x565   : > { %v863_v18 = vpack.c.bf16 %v857_v54, %v857_v54 }
 0x566   : > { %v1914_v55 = vpop.f32.mrf.mxu1 }
 0x568   : > { %v860_v56 = vpop.f32.mrf.mxu1 }
 0x569   : > { %v1829_v56 = vld [vmem:[%s2276_s0 + $0x8] sm:$0xf] }
 0x56a   : > { %v1915_v57 = vpop.f32.mrf.mxu1 }
 0x56b   : > { %v1187_v57 = vsel %vm819_vm4, %v1829_v56, 0 }
 0x56c   : > { %v909_v58 = vpop.f32.mrf.mxu1 }
 0x56d   : > { %v910_v59 = vadd.f32 %v909_v58, %v2363_v35 }
 0x56e   : > { %v1920_v60 = vpop.f32.mrf.mxu1 }
 0x56f   : > { %v915_v61 = vsel %vm755_vm3, %v910_v59, -inf }
 0x570   : > { %916 = vmax.xlane.f32.xlu1 %v915_v61  ;;  %v912_v62 = vpop.f32.mrf.mxu1 }
 0x572   : > { %v1921_v63 = vpop.f32.mrf.mxu1 }
 0x581   : > { %927 = vrot.lane.b32.xlu1 %v2351_v25, %s2139_s30 }
 0x585   : > { %1072 = vrot.lane.b32.xlu1 %v2351_v25, %s2140_s3 }
 0x589   : > { %1070 = vrot.lane.b32.xlu1 %v2351_v25, %s2141_s5 }
 0x5f9   : > { %v917_v0 = vpop.xlane.xlu1 %916 }
 0x5fa   : > { %v918_v2 = vsub.f32 %v910_v59, %v917_v0 }
 0x5fc   : > { %v919_v3 = vmul.f32 1.442695, %v918_v2 }
 0x5fd   : > { %v928_v4 = vpop.permute.xlu1 %927 }
 0x5fe   : > { %2076 = vpow2.f32 %v919_v3  ;;  %v933_v5 = vsel %vm819_vm4, %v928_v4, 0 }
 0x5ff   : > { %1923 = vmatpush3.bf16.msra.mxu0 %v933_v5 }
 0x600   : > { %1934 = vmatprep.subr.bf16.mxu0 %v2132_v9 }
 0x601   : > { %v1073_v20 = vpop.permute.xlu1 %1072 }
 0x602   : > { %v1078_v24 = vsel %vm755_vm3, %v1073_v20, 0 }
 0x605   : > { %v1071_v29 = vpop.permute.xlu1 %1070 }
 0x60b   : > { %v2077_v6 = vpop.eup %2076 }
 0x60c   : > { %v921_v7 = vsel %vm755_vm3, %v2077_v6, 0.0 }
 0x60d   : > { %922 = vadd.xlane.f32.xlu0 %v921_v7 }
 0x623   : > { %1132 = vrot.lane.b32.xlu0 %v2351_v25, %s2142_s29 }
 0x696   : > { %v923_v11 = vpop.xlane.xlu0 %922 }
 0x697   : > { %2078 = vrcp.f32 %v923_v11 }
 0x69a   : > { %v1133_v17 = vpop.permute.xlu0 %1132 }
 0x69b   : > { %v1138_v19 = vsel %vm819_vm4, %v1133_v17, 0 }
 0x6a4   : > { %v2079_v12 = vpop.eup %2078 }
 0x6a5   : > { %v925_v14 = vmul.f32 %v2079_v12, %v2077_v6 }
 0x6a7   : > { %v926_v15 = vpack.c.bf16 %v925_v14, %v925_v14 }
 0x6a9   : > { %1925 = vmatmul.mubr.msk.bf16.vlgmr.msra.gmra.mxu0 %vm755_vm3, %v926_v15 }
 0x6aa   : > { %1935 = vmatpush3.bf16.msra.mxu0 %v1028_v16  ;;  %1936 = vmatprep.mubr.msk.bf16.mxu0 %vm2133_vm2, %v2132_v9  ;;  %v1833_v16 = vld [vmem:[%s2276_s0 + $0xc] sm:$0xf] }
 0x6ab   : > { %1946 = vmatprep.subr.bf16.mxu0 %v2132_v9  ;;  %v1347_v17 = vsel %vm819_vm4, %v1833_v16, 0 }
 0x6b1   : > { %1937 = vmatmul.mubr.msk.bf16.vlgmr.msra.gmra.mxu0 %vm755_vm3, %v863_v18 }
 0x6b2   : > { %1947 = vmatpush3.bf16.msra.mxu0 %v1138_v19  ;;  %1948 = vmatprep.mubr.msk.bf16.mxu0 %vm2133_vm2, %v2132_v9 }
 0x6b3   : > { %1958 = vmatprep.subr.bf16.mxu0 %v2132_v9 }
 0x769   : > { %v969_v21 = vpop.f32.mrf.mxu0 }
 0x76a   : > { %v975_v22 = vpack.c.bf16 %v969_v21, %v969_v21 }
 0x76b   : > { %v1926_v23 = vpop.f32.mrf.mxu0 }
 0x76c   : > { %1931 = vmatmul.mubr.msk.bf16.vlgmr.msra.gmra.mxu1 %vm755_vm3, %v975_v22 }
 0x76d   : > { %1941 = vmatpush3.bf16.xpose.msra.mxu1 %v1078_v24  ;;  %v972_v26 = vpop.f32.mrf.mxu0  ;;  %1942 = vmatprep.mubr.msk.bf16.mxu1 %vm2133_vm2, %v2132_v9 }
 0x76e   : > { %1952 = vmatprep.subr.bf16.mxu1 %v2132_v9 }
 0x76f   : > { %v1927_v27 = vpop.f32.mrf.mxu0 }
 0x771   : > { %v2406_v28 = vpop.f32.mrf.mxu0 }
 0x773   : > { %v1938_v30 = vpop.f32.mrf.mxu0 }
 0x774   : > { %1943 = vmatmul.mubr.msk.bf16.vlgmr.msra.gmra.mxu1 %vm755_vm3, %v1071_v29 }
 0x775   : > { %v1067_v31 = vpop.f32.mrf.mxu0  ;;  %1954 = vmatprep.mubr.msk.bf16.mxu1 %vm2133_vm2, %v2132_v9  ;;  %1953 = vmatpush3.bf16.msra.mxu1 %v1187_v57 }
 0x776   : > { %1964 = vmatprep.subr.bf16.mxu1 %v2132_v9 }
 0x777   : > { %v1939_v32 = vpop.f32.mrf.mxu0 }
 0x778   : > { %v1835_v32 = vld [vmem:[%s2557_s18] ss:$0 sm:$0xff] }
 0x82c   : > { %v2411_v33 = vpop.f32.mrf.mxu1 }
 0x82d   : > { %v1065_v13 = vadd.f32 %v2406_v28, %v2411_v33 }
 0x82e   : > { %v1932_v34 = vpop.f32.mrf.mxu1 }
 0x830   : > { %v1021_v36 = vpop.f32.mrf.mxu1 }
 0x832   : > { %v1933_v37 = vpop.f32.mrf.mxu1 }
 0x834   : > { %v1114_v38 = vpop.f32.mrf.mxu1 }
 0x835   : > { %v1115_v39 = vadd.f32 %v1114_v38, %v2363_v35 }
 0x836   : > { %v1944_v40 = vpop.f32.mrf.mxu1 }
 0x837   : > { %v1120_v41 = vsel %vm755_vm3, %v1115_v39, -inf }
 0x838   : > { %1121 = vmax.xlane.f32.xlu1 %v1120_v41  ;;  %v1117_v42 = vpop.f32.mrf.mxu1 }
 0x83a   : > { %v1945_v43 = vpop.f32.mrf.mxu1 }
 0x8c1   : > { %v1122_v44 = vpop.xlane.xlu1 %1121 }
 0x8c2   : > { %v1123_v45 = vsub.f32 %v1115_v39, %v1122_v44 }
 0x8c4   : > { %v1124_v46 = vmul.f32 1.442695, %v1123_v45  ;;  %v2060_v45 = vld [vmem:[%s2293_s26 + $0x8] sm:$0xff]  }
 0x8c6   : > { %2080 = vpow2.f32 %v1124_v46  ;;  %v2062_v46 = vld [vmem:[%s2307_s22 + $0x38] sm:$0xff]  }
 0x8d3   : > { %v2081_v47 = vpop.eup %2080 }
 0x8d4   : > { %v1126_v48 = vsel %vm755_vm3, %v2081_v47, 0.0 }
 0x8d5   : > { %1127 = vadd.xlane.f32.xlu0 %v1126_v48 }
 0x8eb   : > { %1232 = vrot.lane.b32.xlu0 %v2351_v25, %s2143_s16 }
 0x8ef   : > { %1230 = vrot.lane.b32.xlu0 %v2351_v25, %s2144_s19 }
 0x95e   : > { %v1128_v49 = vpop.xlane.xlu0 %1127 }
 0x95f   : > { %2082 = vrcp.f32 %v1128_v49 }
 0x962   : > { %v1233_v52 = vpop.permute.xlu0 %1232 }
 0x963   : > { %v1238_v54 = vsel %vm755_vm3, %v1233_v52, 0  ;;  %v1836_v52 = vld [vmem:[%s2558_s21] ss:$0 sm:$0xff] }
 0x966   : > { %v1231_v55 = vpop.permute.xlu0 %1230 }
 0x96c   : > { %v2083_v50 = vpop.eup %2082 }
 0x96d   : > { %v1130_v51 = vmul.f32 %v2083_v50, %v2081_v47  ;;  %v2063_v47 = vld [vmem:[%s2307_s22 + $0x30] sm:$0xff]  }
 0x96f   : > { %v1131_v53 = vpack.c.bf16 %v1130_v51, %v1130_v51 }
 0x971   : > { %1949 = vmatmul.mubr.msk.bf16.vlgmr.msra.gmra.mxu0 %vm755_vm3, %v1131_v53 }
 0x972   : > { %1959 = vmatpush3.bf16.xpose.msra.mxu0 %v1238_v54  ;;  %1960 = vmatprep.mubr.msk.bf16.mxu0 %vm2133_vm2, %v2132_v9  ;;  %v1837_v54 = vld [vmem:[%s2559_s27] ss:$0 sm:$0xff] }
 0x973   : > { %1970 = vmatprep.subr.bf16.mxu0 %v2132_v9 }
 0x979   : > { %1961 = vmatmul.mubr.msk.bf16.vlgmr.msra.gmra.mxu0 %vm755_vm3, %v1231_v55 }
 0x97a   : > { %1972 = vmatprep.mubr.msk.bf16.mxu0 %vm2133_vm2, %v2132_v9  ;;  %1971 = vmatpush3.bf16.msra.mxu0 %v1347_v17 }
 0x97b   : > { %1984 = vmatprep.subr.bf16.mxu0 %v2132_v9 }
 0xa31   : > { %v1174_v58 = vpop.f32.mrf.mxu0 }
 0xa32   : > { %v1180_v59 = vpack.c.bf16 %v1174_v58, %v1174_v58  ;;  %v2064_v58 = vld [vmem:[%s2307_s22 + $0x28] sm:$0xff]  }
 0xa33   : > { %v1950_v60 = vpop.f32.mrf.mxu0 }
 0xa34   : > { %1955 = vmatmul.mubr.msk.bf16.vlgmr.msra.gmra.mxu1 %vm755_vm3, %v1180_v59  ;;  %v2065_v59 = vld [vmem:[%s2307_s22 + $0x20] sm:$0xff]   ;;  %v2066_v60 = vld [vmem:[%s2307_s22 + $0x18] sm:$0xff]  }
 0xa35   : > { %v1177_v61 = vpop.f32.mrf.mxu0  ;;  %1966 = vmatprep.mubr.msk.bf16.mxu1 %vm2133_vm2, %v2132_v9 }
 0xa36   : > { %v2067_v61 = vld [vmem:[%s2307_s22 + $0x10] sm:$0xff]  }
 0xa37   : > { %v1951_v62 = vpop.f32.mrf.mxu0 }
 0xa38   : > { %v2068_v62 = vld [vmem:[%s2307_s22 + $0x8] sm:$0xff]  }
 0xa39   : > { %v1274_v63 = vpop.f32.mrf.mxu0 }
 0xa3a   : > { %v1275_v0 = vadd.f32 %v1274_v63, %v2363_v35  ;;  %v2069_v63 = vld [vmem:[%s2307_s22] sm:$0xff]  }
 0xa3b   : > { %v1962_v2 = vpop.f32.mrf.mxu0 }
 0xa3c   : > { %v1280_v3 = vsel %vm755_vm3, %v1275_v0, -inf }
 0xa3d   : > { %1281 = vmax.xlane.f32.xlu1 %v1280_v3  ;;  %v1277_v4 = vpop.f32.mrf.mxu0 }
 0xa3f   : > { %v1963_v5 = vpop.f32.mrf.mxu0 }
 0xa4e   : > { %1292 = vrot.lane.b32.xlu1 %v2351_v25, %s2145_s25 }
 0xac6   : > { %v1282_v6 = vpop.xlane.xlu1 %1281 }
 0xac7   : > { %v1283_v7 = vsub.f32 %v1275_v0, %v1282_v6  ;;  %v1838_v0 = vld [vmem:[%s627_s13] ss:$0 sm:$0xff] }
 0xac9   : > { %v1284_v8 = vmul.f32 1.442695, %v1283_v7 }
 0xaca   : > { %v1293_v10 = vpop.permute.xlu1 %1292 }
 0xacb   : > { %2084 = vpow2.f32 %v1284_v8  ;;  %v1298_v11 = vsel %vm819_vm4, %v1293_v10, 0 }
 0xacc   : > { %1965 = vmatpush3.bf16.msra.mxu1 %v1298_v11 }
 0xacd   : > { %1976 = vmatprep.subr.bf16.mxu1 %v2132_v9 }
 0xad8   : > { %v2085_v35 = vpop.eup %2084 }
 0xad9   : > { %v1286_v12 = vsel %vm755_vm3, %v2085_v35, 0.0 }
 0xada   : > { %1287 = vadd.xlane.f32.xlu0 %v1286_v12  ;;  %v1842_v12 = vld [vmem:[%s635_s23] ss:$0 sm:$0xff] }
 0xaf4   : > { %v1223_v14 = vpop.f32.mrf.mxu1 }
 0xaf5   : > { %v1229_v25 = vadd.f32 %v1223_v14, %v1065_v13 }
 0xaf6   : > { %v1956_v15 = vpop.f32.mrf.mxu1 }
 0xaf8   : > { %v1226_v18 = vpop.f32.mrf.mxu1 }
 0xafa   : > { %v1957_v19 = vpop.f32.mrf.mxu1 }
 0xb63   : > { %v1288_v20 = vpop.xlane.xlu0 %1287 }
 0xb64   : > { %2086 = vrcp.f32 %v1288_v20 }
 0xb71   : > { %v2087_v21 = vpop.eup %2086 }
 0xb72   : > { %v1290_v22 = vmul.f32 %v2087_v21, %v2085_v35 }
 0xb74   : > { %v1291_v23 = vpack.c.bf16 %v1290_v22, %v1290_v22 }
 0xb76   : > { %1967 = vmatmul.mubr.msk.bf16.vlgmr.msra.gmra.mxu1 %vm755_vm3, %v1291_v23 }
 0xb77   : > { %1980 = vmatprep.mubr.msk.bf16.mxu1 %vm2133_vm2, %v2132_v9  ;;  %1977 = vmatpush3.bf16.msra.mxu1 %v2060_v45 }
 0xb78   : > { %1978 = vmatprep.subr.bf16.mxu1 %v2132_v9 }
 0xc36   : > { %v1334_v24 = vpop.f32.mrf.mxu1 }
 0xc37   : > { %v1340_v26 = vpack.c.bf16 %v1334_v24, %v1334_v24 }
 0xc38   : > { %v1968_v27 = vpop.f32.mrf.mxu1 }
 0xc39   : > { %1973 = vmatmul.mubr.msk.bf16.vlgmr.msra.gmra.mxu0 %vm755_vm3, %v1340_v26 }
 0xc3a   : > { %v1337_v28 = vpop.f32.mrf.mxu1  ;;  %2000 = vmatprep.mubr.msk.bf16.mxu0 %vm2133_vm2, %v2132_v9  ;;  %1985 = vmatpush3.bf16.msra.mxu0 %v2062_v46 }
 0xc3b   : > { %1986 = vmatprep.subr.bf16.mxu0 %v2132_v9 }
 0xc3c   : > { %v1969_v29 = vpop.f32.mrf.mxu1 }
 0xc3e   : > { %1987 = vmatpush3.bf16.msra.mxu0 %v2063_v47 }
 0xc3f   : > { %1988 = vmatprep.subr.bf16.mxu0 %v2132_v9 }
 0xc42   : > { %1989 = vmatpush3.bf16.msra.mxu0 %v2064_v58 }
 0xc43   : > { %1990 = vmatprep.subr.bf16.mxu0 %v2132_v9 }
 0xc46   : > { %1991 = vmatpush3.bf16.msra.mxu0 %v2065_v59 }
 0xc47   : > { %1992 = vmatprep.subr.bf16.mxu0 %v2132_v9 }
 0xc4a   : > { %1993 = vmatpush3.bf16.msra.mxu0 %v2066_v60 }
 0xc4b   : > { %1994 = vmatprep.subr.bf16.mxu0 %v2132_v9 }
 0xc4e   : > { %1995 = vmatpush3.bf16.msra.mxu0 %v2067_v61 }
 0xc4f   : > { %1996 = vmatprep.subr.bf16.mxu0 %v2132_v9 }
 0xc52   : > { %1997 = vmatpush3.bf16.msra.mxu0 %v2068_v62 }
 0xc53   : > { %1998 = vmatprep.subr.bf16.mxu0 %v2132_v9 }
 0xc56   : > { %1999 = vmatpush3.bf16.msra.mxu0 %v2069_v63 }
 0xcf9   : > { %v1383_v30 = vpop.f32.mrf.mxu0 }
 0xcfa   : > { %v1389_v31 = vadd.f32 %v1383_v30, %v1229_v25 }
 0xcfb   : > { %v1974_v33 = vpop.f32.mrf.mxu0 }
 0xcfc   : > { %v1390_v34 = vadd.f32 %v1389_v31, %v2317_v1  ;;  %v2061_v1 = vld [vmem:[%s2293_s26] sm:$0xff]  }
 0xcfd   : > { %v1386_v36 = vpop.f32.mrf.mxu0  ;;  %1979 = vmatpush3.bf16.msra.mxu1 %v2061_v1 }
 0xcfe   : > { %v2455_v37 = vadd.f32 %v1835_v32, %v1390_v34 }
 0xcff   : > { %v1975_v38 = vpop.f32.mrf.mxu0 }
 0xd00   : > { %v1401_v39 = vsel %vm651_vm1, %v2455_v37, 0.0 }
 0xd01   : > { %1402 = vadd.xlane.f32.xlu1 %v1401_v39 }
 0xd8a   : > { %v1403_v40 = vpop.xlane.xlu1 %1402 }
 0xd8b   : > { %v1404_v41 = vmul.f32 0.03125, %v1403_v40 }
 0xd8d   : > { %v1405_v42 = vsub.f32 %v2455_v37, %v1404_v41 }
 0xd8f   : > { %v1406_v43 = vmul.f32 %v1405_v42, %v1405_v42 }
 0xd91   : > { %v1407_v44 = vsel %vm651_vm1, %v1406_v43, 0.0 }
 0xd92   : > { %1408 = vadd.xlane.f32.xlu0 %v1407_v44 }
 0xe1b   : > { %v1409_v48 = vpop.xlane.xlu0 %1408 }
 0xe1c   : > { %v1410_v49 = vmul.f32 0.03125, %v1409_v48 }
 0xe1e   : > { %v1411_v50 = vadd.f32 1e-05, %v1410_v49 }
 0xe20   : > { %2088 = vrsqrt.f32 %v1411_v50 }
 0xe2d   : > { %v2089_v51 = vpop.eup %2088 }
 0xe2e   : > { %v1413_v53 = vmul.f32 %v2089_v51, %v1405_v42 }
 0xe30   : > { %v1420_v55 = vmul.f32 %v1836_v52, %v1413_v53 }
 0xe32   : > { %v1427_v56 = vadd.f32 %v1837_v54, %v1420_v55 }
 0xe34   : > { %v1428_v57 = vpack.c.bf16 %v1427_v56, %v1427_v56 }
 0xe36   : > { %1981 = vmatmul.mubr.msk.bf16.vlgmr.msra.gmra.mxu1 %vm651_vm1, %v1428_v57 }
 0xef6   : > { %v1489_v2 = vpop.f32.mrf.mxu1 }
 0xef7   : > { %v1490_v3 = vadd.f32 %v1838_v0, %v1489_v2 }
 0xef8   : > { %v1982_v4 = vpop.f32.mrf.mxu1 }
 0xef9   : > { %v1496_v5 = vmul.f32 0.70710677, %v1490_v3  ;;  %v1495_v10 = vmul.f32 0.5, %v1490_v3 }
 0xefa   : > { %v1492_v6 = vpop.f32.mrf.mxu1 }
 0xefb   : > { %2090 = verf.f32 %v1496_v5 }
 0xefc   : > { %v1983_v7 = vpop.f32.mrf.mxu1 }
 0xf08   : > { %v2091_v8 = vpop.eup %2090 }
 0xf09   : > { %v1498_v11 = vadd.f32 1.0, %v2091_v8 }
 0xf0b   : > { %v1499_v9 = vmul.f32 %v1498_v11, %v1495_v10 }
 0xf0d   : > { %v1500_v35 = vpack.c.bf16 %v1499_v9, %v1499_v9 }
 0xf0f   : > { %2001 = vmatmul.mubr.bf16.vlgmr.msra.gmra.mxu0 %v1500_v35 }
 0xfcf   : > { %v1606_v13 = vpop.f32.mrf.mxu0 }
 0xfd0   : > { %v1607_v14 = vadd.f32 %v1842_v12, %v1606_v13 }
 0xfd1   : > { %v2002_v25 = vpop.f32.mrf.mxu0 }
 0xfd2   : > { %v1612_v15 = vadd.f32 %v1607_v14, %v2455_v37 }
 0xfd3   : > { %v1609_v16 = vpop.f32.mrf.mxu0 }
 0xfd4   : > { %1613 = vst.msk [vmem:[%s2312_s2] sm:$0xff] %vm651_vm1, %v1612_v15 }
 0xfd5   : > { %v2003_v17 = vpop.f32.mrf.mxu0 }
 0xfd6 PF: > { %s2560_s13 = sld [smem:[#allocation5_spill]] }
 0xfd7   : > { %s2561_s25 = sld [smem:[#allocation3_spill]] }
 0xfd8   : > { %s2562_s26 = sld [smem:[#allocation4_spill]] }
 0xfd9   : > { %s2563_s27 = sld [smem:[#allocation6_spill]] }
 0xfda   : > { %s2564_s28 = sld [smem:[#allocation7_spill]] }
 0xfdc   : > { %s23_s29 = sadd.s32 1, %s2560_s13  }
 0xfdd   : > { %p20_p8 = scmp.ge.s32.totalorder %s23_s29, 6  }
 0xfdf   :  { %22 = sbr.rel (!%p20_p8) target bundleno = 6 (0x6), region = 145 }

</bundles_post_ra>
